<compile_context>
chip_gen: v5e
topology: v5e:2x2
jax: 0.10.0
libtpu: 0.0.40
codegen_flags: <defaults>
</compile_context>

<pallas_src>
import math
import numpy as np
import jax
import jax.numpy as jnp
from jax.experimental import pallas as pl
from jax.experimental.pallas import tpu as pltpu


# --------------------------- static host-side (trace-time) matrices ---------------------------

def _pool_matrix(N, Hc, H_out, W, K, pad):
    """AvgPool2d((K,1), stride=(2,1), pad=(pad,0), count_include_pad=True) as a
    (N*Hc*W, N*H_out*W) matrix, with the 1/K divisor folded into the entries."""
    P = np.zeros((Hc, H_out), np.float32)
    for ho in range(H_out):
        for dk in range(K):
            hi = 2 * ho + dk - pad
            if 0 <= hi < Hc:                       # out-of-range rows are the zero padding
                P[hi, ho] = 1.0 / K                # divisor is always K (count_include_pad=True)
    blk = np.kron(P, np.eye(W, dtype=np.float32))  # (Hc*W, H_out*W)
    return np.kron(np.eye(N, dtype=np.float32), blk)


def _shift_matrix(N, H_in, Hc, W, k, pad):
    """Tap k of Conv2d((K,1), pad=(pad,0)) as a 0/1 shift-with-zero-pad matrix
    (N*H_in*W, N*Hc*W):  out[:, ho] = in[:, ho + k - pad] (0 when out of range)."""
    S = np.zeros((H_in, Hc), np.float32)
    for ho in range(Hc):
        hi = ho + k - pad
        if 0 <= hi < H_in:
            S[hi, ho] = 1.0
    blk = np.kron(S, np.eye(W, dtype=np.float32))
    return np.kron(np.eye(N, dtype=np.float32), blk)


# ----------------------------------------- fused kernel -----------------------------------------

def _make_fused_kernel(tail_meta, n_inputs):
    """tail_meta: per conv block i>=1, a (K_i, lanes_i) pair with lanes_i = N*Hc_i*W."""

    def kernel(*refs):
        assert len(refs) == n_inputs + 1           # inputs... , output
        # ---- layer 0: conv + bias as ONE MXU matmul (bias folded via ones row), then tanh ----
        a = jnp.tanh(jnp.dot(refs[1][...], refs[0][...],          # (C0,K0*Cin+1)@(K0*Cin+1, N*Hc0*W)
                             preferred_element_type=jnp.float32))
        r = 2
        # ---- layers 1..L-1: pool(prev)+im2col via ONE wide matmul with a static matrix,
        #      conv as K accumulated tiny matmuls, bias, tanh ----
        for (K_i, lanes_i) in tail_meta:
            m_ref, w_ref, b_ref = refs[r], refs[r + 1], refs[r + 2]
            r += 3
            cols = jnp.dot(a, m_ref[...], preferred_element_type=jnp.float32)   # (C_prev, K_i*lanes_i)
            acc = jnp.dot(w_ref[0], cols[:, :lanes_i], preferred_element_type=jnp.float32)
            for k in range(1, K_i):                 # lane slices at multiples of lanes_i (128-aligned here)
                acc = acc + jnp.dot(w_ref[k], cols[:, k * lanes_i:(k + 1) * lanes_i],
                                    preferred_element_type=jnp.float32)
            a = jnp.tanh(acc + b_ref[...])                                       # (C_i, lanes_i)
        # ---- final avg-pool as one matmul (1/K folded into Q): single lane-dense store ----
        q_ref, o_ref = refs[r], refs[r + 1]
        o_ref[...] = jnp.dot(a, q_ref[...], preferred_element_type=jnp.float32).astype(o_ref.dtype)

    return kernel


# ------------------------------------------- wrapper --------------------------------------------

def cnn_conv_layers_mid(x, params):
    """Fused forward of CNNConvLayersMid.
    x: (N, 1, H, W) f32 NCHW;  params[i] = (w_i, b_i) with w_i: (C_i, C_{i-1}, K_i), b_i: (C_i,).
    Returns (N, C_last, H_out, W)."""
    N, C_in0, H, W = x.shape
    L = len(params)

    # static shape bookkeeping per conv block
    Ks, pads, Hcs, Houts, Cs = [], [], [], [], []
    h_in = H
    for (w, _) in params:
        C_out, _, K = w.shape
        p = K // 2
        hc = h_in + 2 * p - K + 1                   # conv output height
        ho = (hc + 2 * p - K) // 2 + 1              # pool output height (stride 2)
        Ks.append(K); pads.append(p); Hcs.append(hc); Houts.append(ho); Cs.append(C_out)
        h_in = ho

    # ---- layer 0 operands: im2col of the input (+ ones row), weights (+ bias column) ----
    w0, b0 = params[0]
    K0, p0, Hc0 = Ks[0], pads[0], Hcs[0]
    xp = jnp.pad(x, ((0, 0), (0, 0), (p0, p0), (0, 0))).astype(jnp.float32)
    taps = jnp.stack([xp[:, :, k:k + Hc0, :] for k in range(K0)], axis=0)     # (K0, N, Cin, Hc0, W)
    cols0 = jnp.transpose(taps, (0, 2, 1, 3, 4)).reshape(K0 * C_in0, N * Hc0 * W)
    cols0_aug = jnp.concatenate([cols0, jnp.ones((1, N * Hc0 * W), jnp.float32)], axis=0)
    w0_mat = jnp.transpose(w0, (0, 2, 1)).reshape(Cs[0], K0 * C_in0).astype(jnp.float32)
    w0_aug = jnp.concatenate([w0_mat, b0.reshape(Cs[0], 1).astype(jnp.float32)], axis=1)

    operands = [cols0_aug, w0_aug]
    tail_meta = []
    flops = 2 * Cs[0] * (K0 * C_in0 + 1) * (N * Hc0 * W)
    transc = Cs[0] * N * Hc0 * W

    # ---- layers 1..L-1: pre-compose pool(prev) with each conv-tap shift on the host ----
    for i in range(1, L):
        w_i, b_i = params[i]
        K_i, p_i, Hc_i = Ks[i], pads[i], Hcs[i]
        q_prev = _pool_matrix(N, Hcs[i - 1], Houts[i - 1], W, Ks[i - 1], pads[i - 1])
        m_all = np.concatenate(
            [q_prev @ _shift_matrix(N, Houts[i - 1], Hc_i, W, k, p_i) for k in range(K_i)],
            axis=1)                                                            # (N*Hc_{i-1}*W, K_i*N*Hc_i*W)
        w_taps = jnp.transpose(w_i, (2, 0, 1)).astype(jnp.float32)             # (K_i, C_i, C_{i-1})
        operands += [jnp.asarray(m_all), w_taps, b_i.reshape(Cs[i], 1).astype(jnp.float32)]
        lanes_i = N * Hc_i * W
        tail_meta.append((K_i, lanes_i))
        flops += (2 * Cs[i - 1] * (N * Hcs[i - 1] * W) * (K_i * lanes_i)
                  + 2 * Cs[i] * Cs[i - 1] * K_i * lanes_i + Cs[i] * lanes_i)
        transc += Cs[i] * lanes_i

    # ---- final pool matrix (1/K folded into its entries) ----
    q_last = jnp.asarray(_pool_matrix(N, Hcs[-1], Houts[-1], W, Ks[-1], pads[-1]))
    operands.append(q_last)
    lanes_out = N * Houts[-1] * W
    flops += 2 * Cs[-1] * (N * Hcs[-1] * W) * lanes_out

    bytes_accessed = 4 * (sum(int(np.prod(o.shape)) for o in operands) + Cs[-1] * lanes_out)

    out = pl.pallas_call(
        _make_fused_kernel(tuple(tail_meta), len(operands)),
        out_shape=jax.ShapeDtypeStruct((Cs[-1], lanes_out), jnp.float32),
        in_specs=[pl.BlockSpec(memory_space=pltpu.MemorySpace.VMEM) for _ in operands],
        out_specs=pl.BlockSpec(memory_space=pltpu.MemorySpace.VMEM),
        cost_estimate=pl.CostEstimate(flops=int(flops), transcendentals=int(transc),
                                      bytes_accessed=int(bytes_accessed)),
    )(*operands)

    # (C_last, N*H_out*W) -> NCHW; a tiny (few-KB) transpose in the XLA graph.
    return jnp.transpose(out.reshape(Cs[-1], N, Houts[-1], W), (1, 0, 2, 3))


# ----------------------------------- params / reference / main ----------------------------------

def init_params(channels, kernels, key):
    """Deterministic PyTorch-Conv2d-style init: (C_out, C_in, K) weights + (C_out,) bias."""
    params = []
    c_prev = 1
    for l in range(len(kernels) - 1):
        c_out, K = channels[l], kernels[l]
        key, k1, k2 = jax.random.split(key, 3)
        bound = 1.0 / math.sqrt(c_prev * K * 1)
        w = jax.random.uniform(k1, (c_out, c_prev, K), jnp.float32, -bound, bound)
        b = jax.random.uniform(k2, (c_out,), jnp.float32, -bound, bound)
        params.append((w, b))
        c_prev = c_out
    return params


def reference(x, params):
    """Pure-JAX (XLA) reference matching the PyTorch forward exactly."""
    for w, b in params:
        C_out, C_in, K = w.shape
        p = K // 2
        y = jax.lax.conv_general_dilated(
            x, w[..., None], window_strides=(1, 1), padding=((p, p), (0, 0)),
            dimension_numbers=("NCHW", "OIHW", "NCHW"))
        y = jnp.tanh(y + b[None, :, None, None])
        s = jax.lax.reduce_window(
            y, 0.0, jax.lax.add,
            window_dimensions=(1, 1, K, 1), window_strides=(1, 1, 2, 1),
            padding=((0, 0), (0, 0), (p, p), (0, 0)))
        x = s / K  # count_include_pad=True -> divisor is always K
    return x


if __name__ == "__main__":
    channels = [4, 8]
    kernels = [3, 5, 3]          # module uses kernels[0 .. len(kernels)-2]

    key = jax.random.PRNGKey(0)
    key, kx = jax.random.split(key)
    x = jax.random.normal(kx, (2, 1, 16, 16), jnp.float32)   # NCHW, in_channels = 1

    params = init_params(channels, kernels, jax.random.PRNGKey(1))

    fwd = jax.jit(cnn_conv_layers_mid)
    out = jax.block_until_ready(fwd(x, params))

    ref = jax.block_until_ready(reference(x, params))
    assert out.shape == ref.shape, (out.shape, ref.shape)
    assert jnp.allclose(out, ref, atol=1e-4, rtol=1e-4), float(jnp.max(jnp.abs(out - ref)))

    print("KERNEL_OK")
</pallas_src>

<mosaic_0001>
module attributes {stable_mosaic.version = 11 : i64} {
  func.func @kernel(%arg0: memref<4x512xf32, #tpu.memory_space<vmem>>, %arg1: memref<4x4xf32, #tpu.memory_space<vmem>>, %arg2: memref<512x1280xf32, #tpu.memory_space<vmem>>, %arg3: memref<5x8x4xf32, #tpu.memory_space<vmem>>, %arg4: memref<8x1xf32, #tpu.memory_space<vmem>>, %arg5: memref<256x128xf32, #tpu.memory_space<vmem>>, %arg6: memref<8x128xf32, #tpu.memory_space<vmem>>) attributes {dimension_semantics = [], scalar_prefetch = 0 : i64, scratch_operands = 0 : i64, tpu.core_type = #tpu.core_type<tc>} {
    %c0 = arith.constant 0 : index
    %c0_0 = arith.constant 0 : index
    %0 = vector.load %arg1[%c0, %c0_0] : memref<4x4xf32, #tpu.memory_space<vmem>>, vector<4x4xf32>
    %c0_1 = arith.constant 0 : index
    %c0_2 = arith.constant 0 : index
    %1 = vector.load %arg0[%c0_1, %c0_2] : memref<4x512xf32, #tpu.memory_space<vmem>>, vector<4x512xf32>
    %cst = arith.constant dense<0.000000e+00> : vector<4x512xf32>
    %2 = tpu.matmul %0, %1, %cst {dimension_numbers = #tpu.dot_dimension_numbers<[1], [0], [0], [1], [0, 0, 1, 1], [], []>} : vector<4x4xf32>, vector<4x512xf32>, vector<4x512xf32> -> vector<4x512xf32>
    %3 = math.tanh %2 : vector<4x512xf32>
    %c0_3 = arith.constant 0 : index
    %c0_4 = arith.constant 0 : index
    %4 = vector.load %arg2[%c0_3, %c0_4] : memref<512x1280xf32, #tpu.memory_space<vmem>>, vector<512x1280xf32>
    %cst_5 = arith.constant dense<0.000000e+00> : vector<4x1280xf32>
    %5 = tpu.matmul %3, %4, %cst_5 {dimension_numbers = #tpu.dot_dimension_numbers<[1], [0], [0], [1], [0, 0, 1, 1], [], []>} : vector<4x512xf32>, vector<512x1280xf32>, vector<4x1280xf32> -> vector<4x1280xf32>
    %c0_6 = arith.constant 0 : index
    %c0_7 = arith.constant 0 : index
    %c0_8 = arith.constant 0 : index
    %6 = vector.load %arg3[%c0_6, %c0_7, %c0_8] : memref<5x8x4xf32, #tpu.memory_space<vmem>>, vector<1x8x4xf32>
    %7 = vector.shape_cast %6 : vector<1x8x4xf32> to vector<8x4xf32>
    %8 = vector.extract_strided_slice %5 {offsets = [0, 0], sizes = [4, 256], strides = [1, 1]} : vector<4x1280xf32> to vector<4x256xf32>
    %cst_9 = arith.constant dense<0.000000e+00> : vector<8x256xf32>
    %9 = tpu.matmul %7, %8, %cst_9 {dimension_numbers = #tpu.dot_dimension_numbers<[1], [0], [0], [1], [0, 0, 1, 1], [], []>} : vector<8x4xf32>, vector<4x256xf32>, vector<8x256xf32> -> vector<8x256xf32>
    %c1 = arith.constant 1 : index
    %c0_10 = arith.constant 0 : index
    %c0_11 = arith.constant 0 : index
    %10 = vector.load %arg3[%c1, %c0_10, %c0_11] : memref<5x8x4xf32, #tpu.memory_space<vmem>>, vector<1x8x4xf32>
    %11 = vector.shape_cast %10 : vector<1x8x4xf32> to vector<8x4xf32>
    %12 = vector.extract_strided_slice %5 {offsets = [0, 256], sizes = [4, 256], strides = [1, 1]} : vector<4x1280xf32> to vector<4x256xf32>
    %cst_12 = arith.constant dense<0.000000e+00> : vector<8x256xf32>
    %13 = tpu.matmul %11, %12, %cst_12 {dimension_numbers = #tpu.dot_dimension_numbers<[1], [0], [0], [1], [0, 0, 1, 1], [], []>} : vector<8x4xf32>, vector<4x256xf32>, vector<8x256xf32> -> vector<8x256xf32>
    %14 = arith.addf %9, %13 : vector<8x256xf32>
    %c2 = arith.constant 2 : index
    %c0_13 = arith.constant 0 : index
    %c0_14 = arith.constant 0 : index
    %15 = vector.load %arg3[%c2, %c0_13, %c0_14] : memref<5x8x4xf32, #tpu.memory_space<vmem>>, vector<1x8x4xf32>
    %16 = vector.shape_cast %15 : vector<1x8x4xf32> to vector<8x4xf32>
    %17 = vector.extract_strided_slice %5 {offsets = [0, 512], sizes = [4, 256], strides = [1, 1]} : vector<4x1280xf32> to vector<4x256xf32>
    %cst_15 = arith.constant dense<0.000000e+00> : vector<8x256xf32>
    %18 = tpu.matmul %16, %17, %cst_15 {dimension_numbers = #tpu.dot_dimension_numbers<[1], [0], [0], [1], [0, 0, 1, 1], [], []>} : vector<8x4xf32>, vector<4x256xf32>, vector<8x256xf32> -> vector<8x256xf32>
    %19 = arith.addf %14, %18 : vector<8x256xf32>
    %c3 = arith.constant 3 : index
    %c0_16 = arith.constant 0 : index
    %c0_17 = arith.constant 0 : index
    %20 = vector.load %arg3[%c3, %c0_16, %c0_17] : memref<5x8x4xf32, #tpu.memory_space<vmem>>, vector<1x8x4xf32>
    %21 = vector.shape_cast %20 : vector<1x8x4xf32> to vector<8x4xf32>
    %22 = vector.extract_strided_slice %5 {offsets = [0, 768], sizes = [4, 256], strides = [1, 1]} : vector<4x1280xf32> to vector<4x256xf32>
    %cst_18 = arith.constant dense<0.000000e+00> : vector<8x256xf32>
    %23 = tpu.matmul %21, %22, %cst_18 {dimension_numbers = #tpu.dot_dimension_numbers<[1], [0], [0], [1], [0, 0, 1, 1], [], []>} : vector<8x4xf32>, vector<4x256xf32>, vector<8x256xf32> -> vector<8x256xf32>
    %24 = arith.addf %19, %23 : vector<8x256xf32>
    %c4 = arith.constant 4 : index
    %c0_19 = arith.constant 0 : index
    %c0_20 = arith.constant 0 : index
    %25 = vector.load %arg3[%c4, %c0_19, %c0_20] : memref<5x8x4xf32, #tpu.memory_space<vmem>>, vector<1x8x4xf32>
    %26 = vector.shape_cast %25 : vector<1x8x4xf32> to vector<8x4xf32>
    %27 = vector.extract_strided_slice %5 {offsets = [0, 1024], sizes = [4, 256], strides = [1, 1]} : vector<4x1280xf32> to vector<4x256xf32>
    %cst_21 = arith.constant dense<0.000000e+00> : vector<8x256xf32>
    %28 = tpu.matmul %26, %27, %cst_21 {dimension_numbers = #tpu.dot_dimension_numbers<[1], [0], [0], [1], [0, 0, 1, 1], [], []>} : vector<8x4xf32>, vector<4x256xf32>, vector<8x256xf32> -> vector<8x256xf32>
    %29 = arith.addf %24, %28 : vector<8x256xf32>
    %c0_22 = arith.constant 0 : index
    %c0_23 = arith.constant 0 : index
    %30 = vector.load %arg4[%c0_22, %c0_23] : memref<8x1xf32, #tpu.memory_space<vmem>>, vector<8x1xf32>
    %31 = vector.broadcast %30 : vector<8x1xf32> to vector<8x256xf32>
    %32 = arith.addf %29, %31 : vector<8x256xf32>
    %33 = math.tanh %32 : vector<8x256xf32>
    %c0_24 = arith.constant 0 : index
    %c0_25 = arith.constant 0 : index
    %34 = vector.load %arg5[%c0_24, %c0_25] : memref<256x128xf32, #tpu.memory_space<vmem>>, vector<256x128xf32>
    %cst_26 = arith.constant dense<0.000000e+00> : vector<8x128xf32>
    %35 = tpu.matmul %33, %34, %cst_26 {dimension_numbers = #tpu.dot_dimension_numbers<[1], [0], [0], [1], [0, 0, 1, 1], [], []>} : vector<8x256xf32>, vector<256x128xf32>, vector<8x128xf32> -> vector<8x128xf32>
    %c0_27 = arith.constant 0 : index
    %c0_28 = arith.constant 0 : index
    %36 = vector.load %arg6[%c0_27, %c0_28] : memref<8x128xf32, #tpu.memory_space<vmem>>, vector<8x128xf32>
    tpu.vector_store %arg6[%c0_27, %c0_28], %35 {strides = array<i32>} : memref<8x128xf32, #tpu.memory_space<vmem>>, vector<8x128xf32>,
    return
  }
}

</mosaic_0001>

<bundles_post_ra>
// kernel: cnn_conv_layers_mid.1
= control target key start
LH: loop header
LB: loop body
LE: loop exit
PB: predicated region body
PF: predicated region fallthrough
CT: control target
= control target key end

     0   :  { %11 = vsyncpa [#allocation3], 0  ;;  %s2247_s0 = inlined_call_operand.vmem [shape: f32[4,512], index: 0, kind: input, shape index: {}]   ;;  %s2248_s1 = inlined_call_operand.vmem [shape: f32[4,4], index: 1, kind: input, shape index: {}]   ;;  %s2249_s2 = inlined_call_operand.hbm [shape: f32[512,1280], index: 2, kind: input, shape index: {}]   ;;  %s2250_s3 = inlined_call_operand.vmem [shape: f32[5,8,4], index: 3, kind: input, shape index: {}]   ;;  %s2251_s4 = inlined_call_operand.vmem [shape: f32[8,1], index: 4, kind: input, shape index: {}]   ;;  %s2252_s5 = inlined_call_operand.hbm [shape: f32[256,128], index: 5, kind: input, shape index: {}]   ;;  %s2253_s6 = inlined_call_operand.vmem [shape: f32[8,128], index: 6, kind: output, shape index: {}]  }
   0x1   :  { %s21_s23 = sshll.u32 %s2249_s2, 4  ;;  %s22_s23 = int_to_ptr.hbm [resolvable:$true] %s21_s23 }
   0x2   :  { %12 = vsyncpa [#allocation5], 0  ;;  %s2057_s24 = smov [#allocation2]   ;;  %s38_s28 = sshll.u32 %s2252_s5, 4  ;;  %s39_s28 = int_to_ptr.hbm [resolvable:$true] %s38_s28 }
   0x3   :  { %s23_s25 = sshll.u32 %s2057_s24, 4  ;;  %s2058_s29 = smov 1280   ;;  %s24_s25 = int_to_ptr.vmem [resolvable:$true] %s23_s25 }
   0x4   :  { %s2059_s30 = smov 80   ;;  %s2060_s7 = smov [#allocation4]  }
   0x5   :  { %29 = dma.hbm_to_vmem [thread:$0]  %s22_s23, 81920, %s24_s25, [#allocation3], %s2058_s29, %s2058_s29, %s2059_s30  }
   0x6   :  { %s40_s8 = sshll.u32 %s2060_s7, 4  ;;  %s2061_s9 = smov 128   ;;  %s41_s8 = int_to_ptr.vmem [resolvable:$true] %s40_s8 }
   0x7   :  { %s2062_s10 = smov 8  }
   0x8   :  { %46 = dma.hbm_to_vmem [thread:$0]  %s39_s28, 4096, %s41_s8, [#allocation5], %s2061_s9, %s2061_s9, %s2062_s10  }
   0x9   :  { %2053 = dma.done.wait [#allocation3], 81920  }
   0xa   :  { %2054 = vsyncadd [#allocation3], 4294885376 }
   0xb   :  { %2055 = dma.done.wait [#allocation5], 4096  }
   0xc   :  { %2056 = vsyncadd [#allocation5], 4294963200  ;;  %v56_v0 = vld [vmem:[%s2247_s0] sm:$0xff]  ;;  %v57_v1 = vld [vmem:[%s2247_s0 + $0x8] sm:$0xff]  ;;  %vm71_vm0 = vcmask 1043456   ;;  %vm67_vm1 = vcmask 31744  }
   0xd   :  { %60 = vst [vmem:[#allocation1] ss:$2 sm:$0xff] %v56_v0  ;;  %v55_v2 = vld [vmem:[%s2248_s1] sm:$0xf]  ;;  %v314_v7 = vld [vmem:[#allocation2 + $0x4b0] sm:$0xff]  ;;  %v304_v11 = vld [vmem:[#allocation2 + $0x460] sm:$0xff] }
   0xe   :  { %62 = vst [vmem:[#allocation1 + $0x10] ss:$2 sm:$0xff] %v57_v1  ;;  %v474_v8 = vld [vmem:[#allocation2 + $0x9b0] sm:$0xff]  ;;  %v464_v12 = vld [vmem:[#allocation2 + $0x960] sm:$0xff] }
   0xf   :  { %v634_v9 = vld [vmem:[#allocation2 + $0xeb0] sm:$0xff]  ;;  %v624_v13 = vld [vmem:[#allocation2 + $0xe60] sm:$0xff] }
  0x10   :  { %v794_v10 = vld [vmem:[#allocation2 + $0x13b0] sm:$0xff]  ;;  %v784_v14 = vld [vmem:[#allocation2 + $0x1360] sm:$0xff] }
  0x11   :  { %v294_v15 = vld [vmem:[#allocation2 + $0x410] sm:$0xff]  ;;  %v284_v19 = vld [vmem:[#allocation2 + $0x3c0] sm:$0xff] }
  0x12   :  { %v454_v16 = vld [vmem:[#allocation2 + $0x910] sm:$0xff]  ;;  %v444_v20 = vld [vmem:[#allocation2 + $0x8c0] sm:$0xff] }
  0x13   :  { %v614_v17 = vld [vmem:[#allocation2 + $0xe10] sm:$0xff]  ;;  %v604_v21 = vld [vmem:[#allocation2 + $0xdc0] sm:$0xff] }
  0x14   :  { %v63_v3 = vld.sshfl [vmem:[#allocation1] sm:$0xff pattern:$0x75316420]  ;;  %v64_v4 = vld.sshfl [vmem:[#allocation1 + $0x8] sm:$0xff pattern:$0x75316420] }
  0x15   :  { %1953 = vmatpush.msk.msra.mxu0 %vm71_vm0, %v63_v3  ;;  %1955 = vmatpush.msk.msra.mxu1 %vm71_vm0, %v64_v4  ;;  %v65_v5 = vld.sshfl [vmem:[#allocation1 + $0x10] sm:$0xff pattern:$0x75316420]  ;;  %v66_v6 = vld.sshfl [vmem:[#allocation1 + $0x18] sm:$0xff pattern:$0x75316420] }
  0x16   :  { %1957 = vmatpush.msk.msra.mxu2 %vm71_vm0, %v65_v5  ;;  %1959 = vmatpush.msk.msra.mxu3 %vm71_vm0, %v66_v6  ;;  %v774_v18 = vld [vmem:[#allocation2 + $0x1310] sm:$0xff]  ;;  %v764_v22 = vld [vmem:[#allocation2 + $0x12c0] sm:$0xff]  ;;  %v315_v5 = vld [vmem:[#allocation2 + $0x4b8] sm:$0xff] }
  0x17   :  { %1954 = vmatmul.msk.f32.vlgmr.msra.gmra.mxu0 %vm67_vm1, %v55_v2  ;;  %1956 = vmatmul.msk.f32.vlgmr.msra.gmra.mxu1 %vm67_vm1, %v55_v2  ;;  %v274_v23 = vld [vmem:[#allocation2 + $0x370] sm:$0xff]  ;;  %v264_v27 = vld [vmem:[#allocation2 + $0x320] sm:$0xff]  ;;  %v475_v6 = vld [vmem:[#allocation2 + $0x9b8] sm:$0xff] }
  0x18   :  { %1958 = vmatmul.msk.f32.vlgmr.msra.gmra.mxu2 %vm67_vm1, %v55_v2  ;;  %1960 = vmatmul.msk.f32.vlgmr.msra.gmra.mxu3 %vm67_vm1, %v55_v2  ;;  %v434_v24 = vld [vmem:[#allocation2 + $0x870] sm:$0xff]  ;;  %v424_v28 = vld [vmem:[#allocation2 + $0x820] sm:$0xff] }
  0x19   :  { %804 = vmatpush.msrb.mxu0 %v314_v7  ;;  %824 = vmatpush.msrb.mxu1 %v474_v8  ;;  %v594_v25 = vld [vmem:[#allocation2 + $0xd70] sm:$0xff]  ;;  %v584_v29 = vld [vmem:[#allocation2 + $0xd20] sm:$0xff] }
  0x1a   :  { %844 = vmatpush.msrb.mxu2 %v634_v9  ;;  %864 = vmatpush.msrb.mxu3 %v794_v10  ;;  %v754_v26 = vld [vmem:[#allocation2 + $0x1270] sm:$0xff]  ;;  %v744_v30 = vld [vmem:[#allocation2 + $0x1220] sm:$0xff]  ;;  %v305_v9 = vld [vmem:[#allocation2 + $0x468] sm:$0xff] }
  0x1b   :  { %805 = vmatpush.msrb.mxu0 %v304_v11  ;;  %825 = vmatpush.msrb.mxu1 %v464_v12  ;;  %v254_v31 = vld [vmem:[#allocation2 + $0x2d0] sm:$0xff]  ;;  %v244_v35 = vld [vmem:[#allocation2 + $0x280] sm:$0xff]  ;;  %v465_v10 = vld [vmem:[#allocation2 + $0x968] sm:$0xff] }
  0x1c   :  { %845 = vmatpush.msrb.mxu2 %v624_v13  ;;  %865 = vmatpush.msrb.mxu3 %v784_v14  ;;  %v414_v32 = vld [vmem:[#allocation2 + $0x7d0] sm:$0xff]  ;;  %v404_v36 = vld [vmem:[#allocation2 + $0x780] sm:$0xff]  ;;  %v635_v11 = vld [vmem:[#allocation2 + $0xeb8] sm:$0xff] }
  0x1d   :  { %806 = vmatpush.msrb.mxu0 %v294_v15  ;;  %826 = vmatpush.msrb.mxu1 %v454_v16  ;;  %v574_v33 = vld [vmem:[#allocation2 + $0xcd0] sm:$0xff]  ;;  %v564_v37 = vld [vmem:[#allocation2 + $0xc80] sm:$0xff]  ;;  %v795_v12 = vld [vmem:[#allocation2 + $0x13b8] sm:$0xff] }
  0x1e   :  { %846 = vmatpush.msrb.mxu2 %v614_v17  ;;  %866 = vmatpush.msrb.mxu3 %v774_v18  ;;  %v734_v34 = vld [vmem:[#allocation2 + $0x11d0] sm:$0xff]  ;;  %v724_v38 = vld [vmem:[#allocation2 + $0x1180] sm:$0xff]  ;;  %v295_v13 = vld [vmem:[#allocation2 + $0x418] sm:$0xff] }
  0x1f   :  { %807 = vmatpush.msrb.mxu0 %v284_v19  ;;  %827 = vmatpush.msrb.mxu1 %v444_v20  ;;  %v234_v39 = vld [vmem:[#allocation2 + $0x230] sm:$0xff]  ;;  %v224_v43 = vld [vmem:[#allocation2 + $0x1e0] sm:$0xff]  ;;  %v455_v14 = vld [vmem:[#allocation2 + $0x918] sm:$0xff] }
  0x20   :  { %847 = vmatpush.msrb.mxu2 %v604_v21  ;;  %867 = vmatpush.msrb.mxu3 %v764_v22  ;;  %v394_v40 = vld [vmem:[#allocation2 + $0x730] sm:$0xff]  ;;  %v384_v44 = vld [vmem:[#allocation2 + $0x6e0] sm:$0xff]  ;;  %v625_v15 = vld [vmem:[#allocation2 + $0xe68] sm:$0xff] }
  0x21   :  { %808 = vmatpush.msrb.mxu0 %v274_v23  ;;  %828 = vmatpush.msrb.mxu1 %v434_v24  ;;  %v554_v41 = vld [vmem:[#allocation2 + $0xc30] sm:$0xff]  ;;  %v544_v45 = vld [vmem:[#allocation2 + $0xbe0] sm:$0xff]  ;;  %v785_v16 = vld [vmem:[#allocation2 + $0x1368] sm:$0xff] }
  0x22   :  { %848 = vmatpush.msrb.mxu2 %v594_v25  ;;  %868 = vmatpush.msrb.mxu3 %v754_v26  ;;  %v714_v42 = vld [vmem:[#allocation2 + $0x1130] sm:$0xff]  ;;  %v704_v46 = vld [vmem:[#allocation2 + $0x10e0] sm:$0xff]  ;;  %v285_v17 = vld [vmem:[#allocation2 + $0x3c8] sm:$0xff] }
  0x23   :  { %809 = vmatpush.msrb.mxu0 %v264_v27  ;;  %829 = vmatpush.msrb.mxu1 %v424_v28  ;;  %v214_v47 = vld [vmem:[#allocation2 + $0x190] sm:$0xff]  ;;  %v204_v51 = vld [vmem:[#allocation2 + $0x140] sm:$0xff]  ;;  %v445_v18 = vld [vmem:[#allocation2 + $0x8c8] sm:$0xff] }
  0x24   :  { %849 = vmatpush.msrb.mxu2 %v584_v29  ;;  %869 = vmatpush.msrb.mxu3 %v744_v30  ;;  %v374_v48 = vld [vmem:[#allocation2 + $0x690] sm:$0xff]  ;;  %v364_v52 = vld [vmem:[#allocation2 + $0x640] sm:$0xff]  ;;  %v615_v19 = vld [vmem:[#allocation2 + $0xe18] sm:$0xff] }
  0x25   :  { %810 = vmatpush.msrb.mxu0 %v254_v31  ;;  %830 = vmatpush.msrb.mxu1 %v414_v32  ;;  %v534_v49 = vld [vmem:[#allocation2 + $0xb90] sm:$0xff]  ;;  %v524_v53 = vld [vmem:[#allocation2 + $0xb40] sm:$0xff]  ;;  %v775_v20 = vld [vmem:[#allocation2 + $0x1318] sm:$0xff] }
  0x26   :  { %850 = vmatpush.msrb.mxu2 %v574_v33  ;;  %870 = vmatpush.msrb.mxu3 %v734_v34  ;;  %v694_v50 = vld [vmem:[#allocation2 + $0x1090] sm:$0xff]  ;;  %v684_v54 = vld [vmem:[#allocation2 + $0x1040] sm:$0xff]  ;;  %v275_v21 = vld [vmem:[#allocation2 + $0x378] sm:$0xff] }
  0x27   :  { %811 = vmatpush.msrb.mxu0 %v244_v35  ;;  %831 = vmatpush.msrb.mxu1 %v404_v36  ;;  %v194_v55 = vld [vmem:[#allocation2 + $0xf0] sm:$0xff]  ;;  %v184_v59 = vld [vmem:[#allocation2 + $0xa0] sm:$0xff]  ;;  %v435_v22 = vld [vmem:[#allocation2 + $0x878] sm:$0xff] }
  0x28   :  { %851 = vmatpush.msrb.mxu2 %v564_v37  ;;  %871 = vmatpush.msrb.mxu3 %v724_v38  ;;  %v354_v56 = vld [vmem:[#allocation2 + $0x5f0] sm:$0xff]  ;;  %v344_v60 = vld [vmem:[#allocation2 + $0x5a0] sm:$0xff]  ;;  %v605_v23 = vld [vmem:[#allocation2 + $0xdc8] sm:$0xff] }
  0x29   :  { %812 = vmatpush.msrb.mxu0 %v234_v39  ;;  %832 = vmatpush.msrb.mxu1 %v394_v40  ;;  %v514_v57 = vld [vmem:[#allocation2 + $0xaf0] sm:$0xff]  ;;  %v504_v61 = vld [vmem:[#allocation2 + $0xaa0] sm:$0xff]  ;;  %v765_v24 = vld [vmem:[#allocation2 + $0x12c8] sm:$0xff] }
  0x2a   :  { %852 = vmatpush.msrb.mxu2 %v554_v41  ;;  %872 = vmatpush.msrb.mxu3 %v714_v42  ;;  %v674_v58 = vld [vmem:[#allocation2 + $0xff0] sm:$0xff]  ;;  %v664_v62 = vld [vmem:[#allocation2 + $0xfa0] sm:$0xff]  ;;  %v265_v25 = vld [vmem:[#allocation2 + $0x328] sm:$0xff] }
  0x2b   :  { %813 = vmatpush.msrb.mxu0 %v224_v43  ;;  %833 = vmatpush.msrb.mxu1 %v384_v44  ;;  %v174_v63 = vld [vmem:[#allocation2 + $0x50] sm:$0xff]  ;;  %v164_v3 = vld [vmem:[#allocation2] sm:$0xff]  ;;  %v425_v26 = vld [vmem:[#allocation2 + $0x828] sm:$0xff] }
  0x2c   :  { %853 = vmatpush.msrb.mxu2 %v544_v45  ;;  %873 = vmatpush.msrb.mxu3 %v704_v46  ;;  %v334_v0 = vld [vmem:[#allocation2 + $0x550] sm:$0xff]  ;;  %v324_v4 = vld [vmem:[#allocation2 + $0x500] sm:$0xff]  ;;  %v595_v27 = vld [vmem:[#allocation2 + $0xd78] sm:$0xff] }
  0x2d   :  { %814 = vmatpush.msrb.mxu0 %v214_v47  ;;  %834 = vmatpush.msrb.mxu1 %v374_v48  ;;  %v494_v1 = vld [vmem:[#allocation2 + $0xa50] sm:$0xff]  ;;  %v484_v7 = vld [vmem:[#allocation2 + $0xa00] sm:$0xff]  ;;  %v755_v28 = vld [vmem:[#allocation2 + $0x1278] sm:$0xff] }
  0x2e   :  { %854 = vmatpush.msrb.mxu2 %v534_v49  ;;  %874 = vmatpush.msrb.mxu3 %v694_v50  ;;  %v654_v2 = vld [vmem:[#allocation2 + $0xf50] sm:$0xff]  ;;  %v644_v8 = vld [vmem:[#allocation2 + $0xf00] sm:$0xff]  ;;  %v255_v29 = vld [vmem:[#allocation2 + $0x2d8] sm:$0xff] }
  0x2f   :  { %815 = vmatpush.msrb.mxu0 %v204_v51  ;;  %835 = vmatpush.msrb.mxu1 %v364_v52  ;;  %v415_v30 = vld [vmem:[#allocation2 + $0x7d8] sm:$0xff]  ;;  %v585_v31 = vld [vmem:[#allocation2 + $0xd28] sm:$0xff] }
  0x30   :  { %855 = vmatpush.msrb.mxu2 %v524_v53  ;;  %875 = vmatpush.msrb.mxu3 %v684_v54  ;;  %v745_v32 = vld [vmem:[#allocation2 + $0x1228] sm:$0xff]  ;;  %v575_v35 = vld [vmem:[#allocation2 + $0xcd8] sm:$0xff] }
  0x31   :  { %816 = vmatpush.msrb.mxu0 %v194_v55  ;;  %836 = vmatpush.msrb.mxu1 %v354_v56  ;;  %v245_v33 = vld [vmem:[#allocation2 + $0x288] sm:$0xff]  ;;  %v735_v36 = vld [vmem:[#allocation2 + $0x11d8] sm:$0xff] }
  0x32   :  { %856 = vmatpush.msrb.mxu2 %v514_v57  ;;  %876 = vmatpush.msrb.mxu3 %v674_v58  ;;  %v405_v34 = vld [vmem:[#allocation2 + $0x788] sm:$0xff]  ;;  %v235_v37 = vld [vmem:[#allocation2 + $0x238] sm:$0xff] }
  0x33   :  { %817 = vmatpush.msrb.mxu0 %v184_v59  ;;  %837 = vmatpush.msrb.mxu1 %v344_v60  ;;  %v395_v38 = vld [vmem:[#allocation2 + $0x738] sm:$0xff]  ;;  %v565_v39 = vld [vmem:[#allocation2 + $0xc88] sm:$0xff] }
  0x34   :  { %857 = vmatpush.msrb.mxu2 %v504_v61  ;;  %877 = vmatpush.msrb.mxu3 %v664_v62  ;;  %v725_v40 = vld [vmem:[#allocation2 + $0x1188] sm:$0xff]  ;;  %v555_v43 = vld [vmem:[#allocation2 + $0xc38] sm:$0xff] }
  0x35   :  { %818 = vmatpush.msrb.mxu0 %v174_v63  ;;  %838 = vmatpush.msrb.mxu1 %v334_v0  ;;  %v225_v41 = vld [vmem:[#allocation2 + $0x1e8] sm:$0xff]  ;;  %v715_v44 = vld [vmem:[#allocation2 + $0x1138] sm:$0xff] }
  0x36   :  { %858 = vmatpush.msrb.mxu2 %v494_v1  ;;  %878 = vmatpush.msrb.mxu3 %v654_v2  ;;  %v385_v42 = vld [vmem:[#allocation2 + $0x6e8] sm:$0xff]  ;;  %v215_v45 = vld [vmem:[#allocation2 + $0x198] sm:$0xff] }
  0x37   :  { %819 = vmatpush.msrb.mxu0 %v164_v3  ;;  %839 = vmatpush.msrb.mxu1 %v324_v4  ;;  %v375_v46 = vld [vmem:[#allocation2 + $0x698] sm:$0xff]  ;;  %v205_v47 = vld [vmem:[#allocation2 + $0x148] sm:$0xff] }
  0x38   :  { %859 = vmatpush.msrb.mxu2 %v484_v7  ;;  %879 = vmatpush.msrb.mxu3 %v644_v8  ;;  %v365_v48 = vld [vmem:[#allocation2 + $0x648] sm:$0xff]  ;;  %v195_v49 = vld [vmem:[#allocation2 + $0xf8] sm:$0xff] }
  0x39   :  { %884 = vmatpush.msra.mxu0 %v315_v5  ;;  %904 = vmatpush.msra.mxu1 %v475_v6  ;;  %v355_v50 = vld [vmem:[#allocation2 + $0x5f8] sm:$0xff]  ;;  %v545_v51 = vld [vmem:[#allocation2 + $0xbe8] sm:$0xff] }
  0x3a   :  { %924 = vmatpush.msra.mxu2 %v635_v11  ;;  %944 = vmatpush.msra.mxu3 %v795_v12  ;;  %v705_v52 = vld [vmem:[#allocation2 + $0x10e8] sm:$0xff]  ;;  %v535_v55 = vld [vmem:[#allocation2 + $0xb98] sm:$0xff] }
  0x3b   :  { %885 = vmatpush.msra.mxu0 %v305_v9  ;;  %905 = vmatpush.msra.mxu1 %v465_v10  ;;  %v185_v53 = vld [vmem:[#allocation2 + $0xa8] sm:$0xff]  ;;  %v695_v56 = vld [vmem:[#allocation2 + $0x1098] sm:$0xff]  ;;  %v316_v9 = vld [vmem:[#allocation2 + $0x4c0] sm:$0xff] }
  0x3c   :  { %925 = vmatpush.msra.mxu2 %v625_v15  ;;  %945 = vmatpush.msra.mxu3 %v785_v16  ;;  %v345_v54 = vld [vmem:[#allocation2 + $0x5a8] sm:$0xff]  ;;  %v175_v57 = vld [vmem:[#allocation2 + $0x58] sm:$0xff]  ;;  %v306_v15 = vld [vmem:[#allocation2 + $0x470] sm:$0xff] }
  0x3d   :  { %886 = vmatpush.msra.mxu0 %v295_v13  ;;  %906 = vmatpush.msra.mxu1 %v455_v14  ;;  %v335_v58 = vld [vmem:[#allocation2 + $0x558] sm:$0xff]  ;;  %v525_v59 = vld [vmem:[#allocation2 + $0xb48] sm:$0xff]  ;;  %v476_v13 = vld [vmem:[#allocation2 + $0x9c0] sm:$0xff] }
  0x3e   :  { %926 = vmatpush.msra.mxu2 %v615_v19  ;;  %946 = vmatpush.msra.mxu3 %v775_v20  ;;  %v685_v60 = vld [vmem:[#allocation2 + $0x1048] sm:$0xff]  ;;  %v515_v63 = vld [vmem:[#allocation2 + $0xaf8] sm:$0xff]  ;;  %v466_v16 = vld [vmem:[#allocation2 + $0x970] sm:$0xff] }
  0x3f   :  { %887 = vmatpush.msra.mxu0 %v285_v17  ;;  %907 = vmatpush.msra.mxu1 %v445_v18  ;;  %v165_v61 = vld [vmem:[#allocation2 + $0x8] sm:$0xff]  ;;  %v675_v0 = vld [vmem:[#allocation2 + $0xff8] sm:$0xff]  ;;  %v296_v17 = vld [vmem:[#allocation2 + $0x420] sm:$0xff] }
  0x40   :  { %927 = vmatpush.msra.mxu2 %v605_v23  ;;  %947 = vmatpush.msra.mxu3 %v765_v24  ;;  %v325_v62 = vld [vmem:[#allocation2 + $0x508] sm:$0xff]  ;;  %v495_v3 = vld [vmem:[#allocation2 + $0xa58] sm:$0xff]  ;;  %v456_v18 = vld [vmem:[#allocation2 + $0x920] sm:$0xff] }
  0x41   :  { %888 = vmatpush.msra.mxu0 %v275_v21  ;;  %908 = vmatpush.msra.mxu1 %v435_v22  ;;  %v505_v1 = vld [vmem:[#allocation2 + $0xaa8] sm:$0xff]  ;;  %v655_v4 = vld [vmem:[#allocation2 + $0xf58] sm:$0xff]  ;;  %v286_v19 = vld [vmem:[#allocation2 + $0x3d0] sm:$0xff] }
  0x42   :  { %928 = vmatpush.msra.mxu2 %v595_v27  ;;  %948 = vmatpush.msra.mxu3 %v755_v28  ;;  %v665_v2 = vld [vmem:[#allocation2 + $0xfa8] sm:$0xff]  ;;  %v446_v20 = vld [vmem:[#allocation2 + $0x8d0] sm:$0xff]  ;;  %v636_v22 = vld [vmem:[#allocation2 + $0xec0] sm:$0xff] }
  0x43   :  { %889 = vmatpush.msra.mxu0 %v265_v25  ;;  %909 = vmatpush.msra.mxu1 %v425_v26  ;;  %v485_v5 = vld [vmem:[#allocation2 + $0xa08] sm:$0xff]  ;;  %v796_v23 = vld [vmem:[#allocation2 + $0x13c0] sm:$0xff]  ;;  %v626_v27 = vld [vmem:[#allocation2 + $0xe70] sm:$0xff] }
  0x44   :  { %929 = vmatpush.msra.mxu2 %v585_v31  ;;  %949 = vmatpush.msra.mxu3 %v745_v32  ;;  %v645_v6 = vld [vmem:[#allocation2 + $0xf08] sm:$0xff]  ;;  %v276_v25 = vld [vmem:[#allocation2 + $0x380] sm:$0xff]  ;;  %v786_v28 = vld [vmem:[#allocation2 + $0x1370] sm:$0xff] }
  0x45   :  { %890 = vmatpush.msra.mxu0 %v255_v29  ;;  %910 = vmatpush.msra.mxu1 %v415_v30  ;;  %v436_v26 = vld [vmem:[#allocation2 + $0x880] sm:$0xff]  ;;  %v266_v29 = vld [vmem:[#allocation2 + $0x330] sm:$0xff] }
  0x46   :  { %930 = vmatpush.msra.mxu2 %v575_v35  ;;  %950 = vmatpush.msra.mxu3 %v735_v36  ;;  %v426_v30 = vld [vmem:[#allocation2 + $0x830] sm:$0xff]  ;;  %v616_v31 = vld [vmem:[#allocation2 + $0xe20] sm:$0xff] }
  0x47   :  { %891 = vmatpush.msra.mxu0 %v245_v33  ;;  %911 = vmatpush.msra.mxu1 %v405_v34  ;;  %v776_v32 = vld [vmem:[#allocation2 + $0x1320] sm:$0xff]  ;;  %v606_v35 = vld [vmem:[#allocation2 + $0xdd0] sm:$0xff] }
  0x48   :  { %931 = vmatpush.msra.mxu2 %v565_v39  ;;  %951 = vmatpush.msra.mxu3 %v725_v40  ;;  %v256_v33 = vld [vmem:[#allocation2 + $0x2e0] sm:$0xff]  ;;  %v766_v36 = vld [vmem:[#allocation2 + $0x12d0] sm:$0xff] }
  0x49   :  { %892 = vmatpush.msra.mxu0 %v235_v37  ;;  %912 = vmatpush.msra.mxu1 %v395_v38  ;;  %v416_v34 = vld [vmem:[#allocation2 + $0x7e0] sm:$0xff]  ;;  %v246_v37 = vld [vmem:[#allocation2 + $0x290] sm:$0xff] }
  0x4a   :  { %932 = vmatpush.msra.mxu2 %v555_v43  ;;  %952 = vmatpush.msra.mxu3 %v715_v44  ;;  %v406_v38 = vld [vmem:[#allocation2 + $0x790] sm:$0xff]  ;;  %v596_v39 = vld [vmem:[#allocation2 + $0xd80] sm:$0xff] }
  0x4b   :  { %893 = vmatpush.msra.mxu0 %v225_v41  ;;  %913 = vmatpush.msra.mxu1 %v385_v42  ;;  %v756_v40 = vld [vmem:[#allocation2 + $0x1280] sm:$0xff]  ;;  %v586_v43 = vld [vmem:[#allocation2 + $0xd30] sm:$0xff] }
  0x4c   :  { %933 = vmatpush.msra.mxu2 %v545_v51  ;;  %953 = vmatpush.msra.mxu3 %v705_v52  ;;  %v236_v41 = vld [vmem:[#allocation2 + $0x240] sm:$0xff]  ;;  %v746_v44 = vld [vmem:[#allocation2 + $0x1230] sm:$0xff] }
  0x4d   :  { %894 = vmatpush.msra.mxu0 %v215_v45  ;;  %914 = vmatpush.msra.mxu1 %v375_v46  ;;  %v396_v42 = vld [vmem:[#allocation2 + $0x740] sm:$0xff]  ;;  %v226_v45 = vld [vmem:[#allocation2 + $0x1f0] sm:$0xff] }
  0x4e   :  { %934 = vmatpush.msra.mxu2 %v535_v55  ;;  %954 = vmatpush.msra.mxu3 %v695_v56  ;;  %v386_v46 = vld [vmem:[#allocation2 + $0x6f0] sm:$0xff]  ;;  %v556_v55 = vld [vmem:[#allocation2 + $0xc40] sm:$0xff] }
  0x4f   :  { %895 = vmatpush.msra.mxu0 %v205_v47  ;;  %915 = vmatpush.msra.mxu1 %v365_v48  ;;  %v576_v47 = vld [vmem:[#allocation2 + $0xce0] sm:$0xff]  ;;  %v566_v51 = vld [vmem:[#allocation2 + $0xc90] sm:$0xff] }
  0x50   :  { %935 = vmatpush.msra.mxu2 %v525_v59  ;;  %955 = vmatpush.msra.mxu3 %v685_v60  ;;  %v736_v48 = vld [vmem:[#allocation2 + $0x11e0] sm:$0xff]  ;;  %v726_v52 = vld [vmem:[#allocation2 + $0x1190] sm:$0xff] }
  0x51   :  { %896 = vmatpush.msra.mxu0 %v195_v49  ;;  %916 = vmatpush.msra.mxu1 %v355_v50  ;;  %v216_v49 = vld [vmem:[#allocation2 + $0x1a0] sm:$0xff]  ;;  %v546_v59 = vld [vmem:[#allocation2 + $0xbf0] sm:$0xff] }
  0x52   :  { %936 = vmatpush.msra.mxu2 %v515_v63  ;;  %956 = vmatpush.msra.mxu3 %v675_v0  ;;  %v376_v50 = vld [vmem:[#allocation2 + $0x6a0] sm:$0xff]  ;;  %v706_v60 = vld [vmem:[#allocation2 + $0x10f0] sm:$0xff] }
  0x53   :  { %897 = vmatpush.msra.mxu0 %v185_v53  ;;  %917 = vmatpush.msra.mxu1 %v345_v54  ;;  %v206_v53 = vld [vmem:[#allocation2 + $0x150] sm:$0xff]  ;;  %v716_v56 = vld [vmem:[#allocation2 + $0x1140] sm:$0xff] }
  0x54   :  { %937 = vmatpush.msra.mxu2 %v505_v1  ;;  %957 = vmatpush.msra.mxu3 %v665_v2  ;;  %v366_v54 = vld [vmem:[#allocation2 + $0x650] sm:$0xff]  ;;  %v536_v63 = vld [vmem:[#allocation2 + $0xba0] sm:$0xff] }
  0x55   :  { %898 = vmatpush.msra.mxu0 %v175_v57  ;;  %918 = vmatpush.msra.mxu1 %v335_v58  ;;  %v196_v57 = vld [vmem:[#allocation2 + $0x100] sm:$0xff] }
  0x56   :  { %938 = vmatpush.msra.mxu2 %v495_v3  ;;  %958 = vmatpush.msra.mxu3 %v655_v4  ;;  %v356_v58 = vld [vmem:[#allocation2 + $0x600] sm:$0xff]  ;;  %v526_v3 = vld [vmem:[#allocation2 + $0xb50] sm:$0xff] }
  0x57   :  { %899 = vmatpush.msra.mxu0 %v165_v61  ;;  %919 = vmatpush.msra.mxu1 %v325_v62  ;;  %v186_v61 = vld [vmem:[#allocation2 + $0xb0] sm:$0xff]  ;;  %v696_v0 = vld [vmem:[#allocation2 + $0x10a0] sm:$0xff] }
  0x58   :  { %939 = vmatpush.msra.mxu2 %v485_v5  ;;  %959 = vmatpush.msra.mxu3 %v645_v6  ;;  %v346_v62 = vld [vmem:[#allocation2 + $0x5b0] sm:$0xff]  ;;  %v176_v1 = vld [vmem:[#allocation2 + $0x60] sm:$0xff] }
  0x59   :  { %v336_v2 = vld [vmem:[#allocation2 + $0x560] sm:$0xff]  ;;  %v686_v4 = vld [vmem:[#allocation2 + $0x1050] sm:$0xff] }
  0x5a   :  { %v166_v5 = vld [vmem:[#allocation2 + $0x10] sm:$0xff] }
  0x5b   :  { %v326_v6 = vld [vmem:[#allocation2 + $0x510] sm:$0xff] }
  0x94   :  { %v97_v7 = vpop.f32.mrf.mxu0  ;;  %v117_v8 = vpop.f32.mrf.mxu1 }
  0x95   :  { %1993 = vtanh.f32 %v97_v7  ;;  %v516_v7 = vld [vmem:[#allocation2 + $0xb00] sm:$0xff] }
  0x96   :  { %1995 = vtanh.f32 %v117_v8  ;;  %v676_v8 = vld [vmem:[#allocation2 + $0x1000] sm:$0xff] }
  0x9b   :  { %v2122_v10 = vpop.eup %1993  ;;  %v137_v11 = vpop.f32.mrf.mxu2 }
  0x9c   :  { %v157_v12 = vpop.f32.mrf.mxu3  ;;  %v2124_v14 = vpop.eup %1995  ;;  %1997 = vtanh.f32 %v137_v11  ;;  %820 = vmatmul.f32.vlgmr.msrb.gmra.mxu0 %v2122_v10  ;;  %v477_v11 = vld [vmem:[#allocation2 + $0x9c8] sm:$0xff] }
  0x9d   :  { %1999 = vtanh.f32 %v157_v12  ;;  %840 = vmatmul.f32.vlgmr.msrb.gmra.mxu1 %v2124_v14  ;;  %964 = vmatpush.msrb.mxu0 %v316_v9  ;;  %v317_v9 = vld [vmem:[#allocation2 + $0x4c8] sm:$0xff]  ;;  %v506_v12 = vld [vmem:[#allocation2 + $0xab0] sm:$0xff] }
  0x9e   :  { %984 = vmatpush.msrb.mxu1 %v476_v13  ;;  %v666_v13 = vld [vmem:[#allocation2 + $0xfb0] sm:$0xff] }
  0x9f   :  { %965 = vmatpush.msrb.mxu0 %v306_v15  ;;  %v307_v15 = vld [vmem:[#allocation2 + $0x478] sm:$0xff] }
  0xa0   :  { %985 = vmatpush.msrb.mxu1 %v466_v16  ;;  %v467_v16 = vld [vmem:[#allocation2 + $0x978] sm:$0xff] }
  0xa1   :  { %966 = vmatpush.msrb.mxu0 %v296_v17  ;;  %v496_v17 = vld [vmem:[#allocation2 + $0xa60] sm:$0xff] }
  0xa2   :  { %v2128_v21 = vpop.eup %1997  ;;  %986 = vmatpush.msrb.mxu1 %v456_v18  ;;  %v656_v18 = vld [vmem:[#allocation2 + $0xf60] sm:$0xff] }
  0xa3   :  { %v2130_v24 = vpop.eup %1999  ;;  %860 = vmatmul.f32.vlgmr.msrb.gmra.mxu2 %v2128_v21  ;;  %967 = vmatpush.msrb.mxu0 %v286_v19  ;;  %v297_v19 = vld [vmem:[#allocation2 + $0x428] sm:$0xff] }
  0xa4   :  { %880 = vmatmul.f32.vlgmr.msrb.gmra.mxu3 %v2130_v24  ;;  %987 = vmatpush.msrb.mxu1 %v446_v20  ;;  %v457_v20 = vld [vmem:[#allocation2 + $0x928] sm:$0xff] }
  0xa5   :  { %1004 = vmatpush.msrb.mxu2 %v636_v22  ;;  %1024 = vmatpush.msrb.mxu3 %v796_v23  ;;  %v486_v22 = vld [vmem:[#allocation2 + $0xa10] sm:$0xff] }
  0xa6   :  { %968 = vmatpush.msrb.mxu0 %v276_v25  ;;  %988 = vmatpush.msrb.mxu1 %v436_v26  ;;  %v646_v23 = vld [vmem:[#allocation2 + $0xf10] sm:$0xff]  ;;  %v287_v25 = vld [vmem:[#allocation2 + $0x3d8] sm:$0xff] }
  0xa7   :  { %1005 = vmatpush.msrb.mxu2 %v626_v27  ;;  %1025 = vmatpush.msrb.mxu3 %v786_v28  ;;  %v447_v26 = vld [vmem:[#allocation2 + $0x8d8] sm:$0xff]  ;;  %v637_v27 = vld [vmem:[#allocation2 + $0xec8] sm:$0xff] }
  0xa8   :  { %900 = vmatmul.f32.vlgmr.msra.gmra.mxu0 %v2122_v10  ;;  %920 = vmatmul.f32.vlgmr.msra.gmra.mxu1 %v2124_v14  ;;  %v797_v28 = vld [vmem:[#allocation2 + $0x13c8] sm:$0xff] }
  0xa9   :  { %969 = vmatpush.msrb.mxu0 %v266_v29  ;;  %989 = vmatpush.msrb.mxu1 %v426_v30  ;;  %v277_v29 = vld [vmem:[#allocation2 + $0x388] sm:$0xff] }
  0xaa   :  { %1006 = vmatpush.msrb.mxu2 %v616_v31  ;;  %1026 = vmatpush.msrb.mxu3 %v776_v32  ;;  %v437_v30 = vld [vmem:[#allocation2 + $0x888] sm:$0xff]  ;;  %v627_v31 = vld [vmem:[#allocation2 + $0xe78] sm:$0xff] }
  0xab   :  { %970 = vmatpush.msrb.mxu0 %v256_v33  ;;  %990 = vmatpush.msrb.mxu1 %v416_v34  ;;  %v787_v32 = vld [vmem:[#allocation2 + $0x1378] sm:$0xff] }
  0xac   :  { %1007 = vmatpush.msrb.mxu2 %v606_v35  ;;  %1027 = vmatpush.msrb.mxu3 %v766_v36  ;;  %v267_v33 = vld [vmem:[#allocation2 + $0x338] sm:$0xff]  ;;  %v617_v35 = vld [vmem:[#allocation2 + $0xe28] sm:$0xff] }
  0xad   :  { %940 = vmatmul.f32.vlgmr.msra.gmra.mxu2 %v2128_v21  ;;  %960 = vmatmul.f32.vlgmr.msra.gmra.mxu3 %v2130_v24  ;;  %v427_v34 = vld [vmem:[#allocation2 + $0x838] sm:$0xff]  ;;  %v777_v36 = vld [vmem:[#allocation2 + $0x1328] sm:$0xff] }
  0xae   :  { %971 = vmatpush.msrb.mxu0 %v246_v37  ;;  %991 = vmatpush.msrb.mxu1 %v406_v38  ;;  %v257_v37 = vld [vmem:[#allocation2 + $0x2e8] sm:$0xff] }
  0xaf   :  { %1008 = vmatpush.msrb.mxu2 %v596_v39  ;;  %1028 = vmatpush.msrb.mxu3 %v756_v40  ;;  %v417_v38 = vld [vmem:[#allocation2 + $0x7e8] sm:$0xff]  ;;  %v607_v39 = vld [vmem:[#allocation2 + $0xdd8] sm:$0xff] }
  0xb0   :  { %972 = vmatpush.msrb.mxu0 %v236_v41  ;;  %992 = vmatpush.msrb.mxu1 %v396_v42  ;;  %v767_v40 = vld [vmem:[#allocation2 + $0x12d8] sm:$0xff] }
  0xb1   :  { %1009 = vmatpush.msrb.mxu2 %v586_v43  ;;  %1029 = vmatpush.msrb.mxu3 %v746_v44  ;;  %v247_v41 = vld [vmem:[#allocation2 + $0x298] sm:$0xff]  ;;  %v597_v43 = vld [vmem:[#allocation2 + $0xd88] sm:$0xff] }
  0xb2   :  { %973 = vmatpush.msrb.mxu0 %v226_v45  ;;  %993 = vmatpush.msrb.mxu1 %v386_v46  ;;  %v407_v42 = vld [vmem:[#allocation2 + $0x798] sm:$0xff]  ;;  %v757_v44 = vld [vmem:[#allocation2 + $0x1288] sm:$0xff] }
  0xb3   :  { %1010 = vmatpush.msrb.mxu2 %v576_v47  ;;  %1030 = vmatpush.msrb.mxu3 %v736_v48  ;;  %v237_v45 = vld [vmem:[#allocation2 + $0x248] sm:$0xff]  ;;  %v587_v47 = vld [vmem:[#allocation2 + $0xd38] sm:$0xff] }
  0xb4   :  { %974 = vmatpush.msrb.mxu0 %v216_v49  ;;  %994 = vmatpush.msrb.mxu1 %v376_v50  ;;  %v397_v46 = vld [vmem:[#allocation2 + $0x748] sm:$0xff]  ;;  %v747_v48 = vld [vmem:[#allocation2 + $0x1238] sm:$0xff] }
  0xb5   :  { %1011 = vmatpush.msrb.mxu2 %v566_v51  ;;  %1031 = vmatpush.msrb.mxu3 %v726_v52  ;;  %v227_v49 = vld [vmem:[#allocation2 + $0x1f8] sm:$0xff]  ;;  %v577_v51 = vld [vmem:[#allocation2 + $0xce8] sm:$0xff] }
  0xb6   :  { %975 = vmatpush.msrb.mxu0 %v206_v53  ;;  %995 = vmatpush.msrb.mxu1 %v366_v54  ;;  %v387_v50 = vld [vmem:[#allocation2 + $0x6f8] sm:$0xff]  ;;  %v737_v52 = vld [vmem:[#allocation2 + $0x11e8] sm:$0xff] }
  0xb7   :  { %1012 = vmatpush.msrb.mxu2 %v556_v55  ;;  %1032 = vmatpush.msrb.mxu3 %v716_v56  ;;  %v217_v53 = vld [vmem:[#allocation2 + $0x1a8] sm:$0xff]  ;;  %v567_v55 = vld [vmem:[#allocation2 + $0xc98] sm:$0xff] }
  0xb8   :  { %976 = vmatpush.msrb.mxu0 %v196_v57  ;;  %996 = vmatpush.msrb.mxu1 %v356_v58  ;;  %v377_v54 = vld [vmem:[#allocation2 + $0x6a8] sm:$0xff]  ;;  %v727_v56 = vld [vmem:[#allocation2 + $0x1198] sm:$0xff] }
  0xb9   :  { %1013 = vmatpush.msrb.mxu2 %v546_v59  ;;  %1033 = vmatpush.msrb.mxu3 %v706_v60  ;;  %v207_v57 = vld [vmem:[#allocation2 + $0x158] sm:$0xff]  ;;  %v557_v59 = vld [vmem:[#allocation2 + $0xc48] sm:$0xff] }
  0xba   :  { %977 = vmatpush.msrb.mxu0 %v186_v61  ;;  %997 = vmatpush.msrb.mxu1 %v346_v62  ;;  %v367_v58 = vld [vmem:[#allocation2 + $0x658] sm:$0xff]  ;;  %v717_v60 = vld [vmem:[#allocation2 + $0x1148] sm:$0xff] }
  0xbb   :  { %1014 = vmatpush.msrb.mxu2 %v536_v63  ;;  %1034 = vmatpush.msrb.mxu3 %v696_v0  ;;  %v197_v61 = vld [vmem:[#allocation2 + $0x108] sm:$0xff]  ;;  %v547_v63 = vld [vmem:[#allocation2 + $0xbf8] sm:$0xff] }
  0xbc   :  { %978 = vmatpush.msrb.mxu0 %v176_v1  ;;  %998 = vmatpush.msrb.mxu1 %v336_v2  ;;  %v357_v62 = vld [vmem:[#allocation2 + $0x608] sm:$0xff]  ;;  %v707_v0 = vld [vmem:[#allocation2 + $0x10f8] sm:$0xff] }
  0xbd   :  { %1015 = vmatpush.msrb.mxu2 %v526_v3  ;;  %1035 = vmatpush.msrb.mxu3 %v686_v4  ;;  %v187_v1 = vld [vmem:[#allocation2 + $0xb8] sm:$0xff]  ;;  %v537_v3 = vld [vmem:[#allocation2 + $0xba8] sm:$0xff] }
  0xbe   :  { %979 = vmatpush.msrb.mxu0 %v166_v5  ;;  %999 = vmatpush.msrb.mxu1 %v326_v6  ;;  %v347_v2 = vld [vmem:[#allocation2 + $0x5b8] sm:$0xff]  ;;  %v697_v4 = vld [vmem:[#allocation2 + $0x10a8] sm:$0xff] }
  0xbf   :  { %1016 = vmatpush.msrb.mxu2 %v516_v7  ;;  %1036 = vmatpush.msrb.mxu3 %v676_v8  ;;  %v177_v5 = vld [vmem:[#allocation2 + $0x68] sm:$0xff]  ;;  %v527_v7 = vld [vmem:[#allocation2 + $0xb58] sm:$0xff] }
  0xc0   :  { %980 = vmatmul.f32.vlgmr.msrb.gmra.mxu0 %v2122_v10  ;;  %1000 = vmatmul.f32.vlgmr.msrb.gmra.mxu1 %v2124_v14  ;;  %v337_v6 = vld [vmem:[#allocation2 + $0x568] sm:$0xff]  ;;  %v687_v8 = vld [vmem:[#allocation2 + $0x1058] sm:$0xff] }
  0xc1   :  { %1044 = vmatpush.msra.mxu0 %v317_v9  ;;  %1064 = vmatpush.msra.mxu1 %v477_v11  ;;  %v167_v9 = vld [vmem:[#allocation2 + $0x18] sm:$0xff] }
  0xc2   :  { %1017 = vmatpush.msrb.mxu2 %v506_v12  ;;  %1037 = vmatpush.msrb.mxu3 %v666_v13  ;;  %v327_v11 = vld [vmem:[#allocation2 + $0x518] sm:$0xff]  ;;  %v517_v12 = vld [vmem:[#allocation2 + $0xb08] sm:$0xff] }
  0xc3   :  { %1045 = vmatpush.msra.mxu0 %v307_v15  ;;  %1065 = vmatpush.msra.mxu1 %v467_v16  ;;  %v677_v13 = vld [vmem:[#allocation2 + $0x1008] sm:$0xff]  ;;  %v318_v15 = vld [vmem:[#allocation2 + $0x4d0] sm:$0xff] }
  0xc4   :  { %1018 = vmatpush.msrb.mxu2 %v496_v17  ;;  %1038 = vmatpush.msrb.mxu3 %v656_v18  ;;  %v478_v16 = vld [vmem:[#allocation2 + $0x9d0] sm:$0xff]  ;;  %v507_v17 = vld [vmem:[#allocation2 + $0xab8] sm:$0xff] }
  0xc5   :  { %1046 = vmatpush.msra.mxu0 %v297_v19  ;;  %1066 = vmatpush.msra.mxu1 %v457_v20  ;;  %v667_v18 = vld [vmem:[#allocation2 + $0xfb8] sm:$0xff]  ;;  %v308_v19 = vld [vmem:[#allocation2 + $0x480] sm:$0xff] }
  0xc6   :  { %1019 = vmatpush.msrb.mxu2 %v486_v22  ;;  %1039 = vmatpush.msrb.mxu3 %v646_v23  ;;  %v468_v20 = vld [vmem:[#allocation2 + $0x980] sm:$0xff]  ;;  %v497_v22 = vld [vmem:[#allocation2 + $0xa68] sm:$0xff] }
  0xc7   :  { %1020 = vmatmul.f32.vlgmr.msrb.gmra.mxu2 %v2128_v21  ;;  %1040 = vmatmul.f32.vlgmr.msrb.gmra.mxu3 %v2130_v24  ;;  %v657_v23 = vld [vmem:[#allocation2 + $0xf68] sm:$0xff] }
  0xc8   :  { %1047 = vmatpush.msra.mxu0 %v287_v25  ;;  %1067 = vmatpush.msra.mxu1 %v447_v26  ;;  %v298_v25 = vld [vmem:[#allocation2 + $0x430] sm:$0xff] }
  0xc9   :  { %1084 = vmatpush.msra.mxu2 %v637_v27  ;;  %1104 = vmatpush.msra.mxu3 %v797_v28  ;;  %v458_v26 = vld [vmem:[#allocation2 + $0x930] sm:$0xff]  ;;  %v487_v27 = vld [vmem:[#allocation2 + $0xa18] sm:$0xff] }
  0xca   :  { %1048 = vmatpush.msra.mxu0 %v277_v29  ;;  %1068 = vmatpush.msra.mxu1 %v437_v30  ;;  %v647_v28 = vld [vmem:[#allocation2 + $0xf18] sm:$0xff]  ;;  %v288_v29 = vld [vmem:[#allocation2 + $0x3e0] sm:$0xff] }
  0xcb   :  { %1085 = vmatpush.msra.mxu2 %v627_v31  ;;  %1105 = vmatpush.msra.mxu3 %v787_v32  ;;  %v448_v30 = vld [vmem:[#allocation2 + $0x8e0] sm:$0xff]  ;;  %v638_v31 = vld [vmem:[#allocation2 + $0xed0] sm:$0xff] }
  0xcc   :  { %1049 = vmatpush.msra.mxu0 %v267_v33  ;;  %1069 = vmatpush.msra.mxu1 %v427_v34  ;;  %v798_v32 = vld [vmem:[#allocation2 + $0x13d0] sm:$0xff] }
  0xcd   :  { %1086 = vmatpush.msra.mxu2 %v617_v35  ;;  %1106 = vmatpush.msra.mxu3 %v777_v36  ;;  %v278_v33 = vld [vmem:[#allocation2 + $0x390] sm:$0xff]  ;;  %v628_v35 = vld [vmem:[#allocation2 + $0xe80] sm:$0xff] }
  0xce   :  { %1050 = vmatpush.msra.mxu0 %v257_v37  ;;  %1070 = vmatpush.msra.mxu1 %v417_v38  ;;  %v438_v34 = vld [vmem:[#allocation2 + $0x890] sm:$0xff]  ;;  %v788_v36 = vld [vmem:[#allocation2 + $0x1380] sm:$0xff] }
  0xcf   :  { %1087 = vmatpush.msra.mxu2 %v607_v39  ;;  %1107 = vmatpush.msra.mxu3 %v767_v40  ;;  %v268_v37 = vld [vmem:[#allocation2 + $0x340] sm:$0xff]  ;;  %v618_v39 = vld [vmem:[#allocation2 + $0xe30] sm:$0xff] }
  0xd0   :  { %1051 = vmatpush.msra.mxu0 %v247_v41  ;;  %1071 = vmatpush.msra.mxu1 %v407_v42  ;;  %v428_v38 = vld [vmem:[#allocation2 + $0x840] sm:$0xff]  ;;  %v778_v40 = vld [vmem:[#allocation2 + $0x1330] sm:$0xff] }
  0xd1   :  { %1088 = vmatpush.msra.mxu2 %v597_v43  ;;  %1108 = vmatpush.msra.mxu3 %v757_v44  ;;  %v258_v41 = vld [vmem:[#allocation2 + $0x2f0] sm:$0xff]  ;;  %v608_v43 = vld [vmem:[#allocation2 + $0xde0] sm:$0xff] }
  0xd2   :  { %1052 = vmatpush.msra.mxu0 %v237_v45  ;;  %1072 = vmatpush.msra.mxu1 %v397_v46  ;;  %v418_v42 = vld [vmem:[#allocation2 + $0x7f0] sm:$0xff]  ;;  %v768_v44 = vld [vmem:[#allocation2 + $0x12e0] sm:$0xff] }
  0xd3   :  { %1089 = vmatpush.msra.mxu2 %v587_v47  ;;  %1109 = vmatpush.msra.mxu3 %v747_v48  ;;  %v248_v45 = vld [vmem:[#allocation2 + $0x2a0] sm:$0xff]  ;;  %v598_v47 = vld [vmem:[#allocation2 + $0xd90] sm:$0xff] }
  0xd4   :  { %1053 = vmatpush.msra.mxu0 %v227_v49  ;;  %1073 = vmatpush.msra.mxu1 %v387_v50  ;;  %v408_v46 = vld [vmem:[#allocation2 + $0x7a0] sm:$0xff]  ;;  %v758_v48 = vld [vmem:[#allocation2 + $0x1290] sm:$0xff] }
  0xd5   :  { %1090 = vmatpush.msra.mxu2 %v577_v51  ;;  %1110 = vmatpush.msra.mxu3 %v737_v52  ;;  %v238_v49 = vld [vmem:[#allocation2 + $0x250] sm:$0xff]  ;;  %v588_v51 = vld [vmem:[#allocation2 + $0xd40] sm:$0xff] }
  0xd6   :  { %1054 = vmatpush.msra.mxu0 %v217_v53  ;;  %1074 = vmatpush.msra.mxu1 %v377_v54  ;;  %v398_v50 = vld [vmem:[#allocation2 + $0x750] sm:$0xff]  ;;  %v748_v52 = vld [vmem:[#allocation2 + $0x1240] sm:$0xff] }
  0xd7   :  { %1091 = vmatpush.msra.mxu2 %v567_v55  ;;  %1111 = vmatpush.msra.mxu3 %v727_v56  ;;  %v228_v53 = vld [vmem:[#allocation2 + $0x200] sm:$0xff]  ;;  %v578_v55 = vld [vmem:[#allocation2 + $0xcf0] sm:$0xff] }
  0xd8   :  { %1055 = vmatpush.msra.mxu0 %v207_v57  ;;  %1075 = vmatpush.msra.mxu1 %v367_v58  ;;  %v388_v54 = vld [vmem:[#allocation2 + $0x700] sm:$0xff]  ;;  %v738_v56 = vld [vmem:[#allocation2 + $0x11f0] sm:$0xff] }
  0xd9   :  { %1092 = vmatpush.msra.mxu2 %v557_v59  ;;  %1112 = vmatpush.msra.mxu3 %v717_v60  ;;  %v218_v57 = vld [vmem:[#allocation2 + $0x1b0] sm:$0xff]  ;;  %v568_v59 = vld [vmem:[#allocation2 + $0xca0] sm:$0xff] }
  0xda   :  { %1056 = vmatpush.msra.mxu0 %v197_v61  ;;  %1076 = vmatpush.msra.mxu1 %v357_v62  ;;  %v378_v58 = vld [vmem:[#allocation2 + $0x6b0] sm:$0xff]  ;;  %v728_v60 = vld [vmem:[#allocation2 + $0x11a0] sm:$0xff] }
  0xdb   :  { %1093 = vmatpush.msra.mxu2 %v547_v63  ;;  %1113 = vmatpush.msra.mxu3 %v707_v0  ;;  %v208_v61 = vld [vmem:[#allocation2 + $0x160] sm:$0xff]  ;;  %v558_v63 = vld [vmem:[#allocation2 + $0xc50] sm:$0xff] }
  0xdc   :  { %1057 = vmatpush.msra.mxu0 %v187_v1  ;;  %1077 = vmatpush.msra.mxu1 %v347_v2  ;;  %v368_v62 = vld [vmem:[#allocation2 + $0x660] sm:$0xff]  ;;  %v718_v0 = vld [vmem:[#allocation2 + $0x1150] sm:$0xff] }
  0xdd   :  { %1094 = vmatpush.msra.mxu2 %v537_v3  ;;  %1114 = vmatpush.msra.mxu3 %v697_v4  ;;  %v198_v1 = vld [vmem:[#allocation2 + $0x110] sm:$0xff]  ;;  %v548_v3 = vld [vmem:[#allocation2 + $0xc00] sm:$0xff] }
  0xde   :  { %1058 = vmatpush.msra.mxu0 %v177_v5  ;;  %1078 = vmatpush.msra.mxu1 %v337_v6  ;;  %v358_v2 = vld [vmem:[#allocation2 + $0x610] sm:$0xff]  ;;  %v708_v4 = vld [vmem:[#allocation2 + $0x1100] sm:$0xff] }
  0xdf   :  { %1095 = vmatpush.msra.mxu2 %v527_v7  ;;  %1115 = vmatpush.msra.mxu3 %v687_v8  ;;  %v188_v5 = vld [vmem:[#allocation2 + $0xc0] sm:$0xff]  ;;  %v538_v7 = vld [vmem:[#allocation2 + $0xbb0] sm:$0xff] }
  0xe0   :  { %1059 = vmatpush.msra.mxu0 %v167_v9  ;;  %1079 = vmatpush.msra.mxu1 %v327_v11  ;;  %v348_v6 = vld [vmem:[#allocation2 + $0x5c0] sm:$0xff]  ;;  %v698_v8 = vld [vmem:[#allocation2 + $0x10b0] sm:$0xff] }
  0xe1   :  { %1096 = vmatpush.msra.mxu2 %v517_v12  ;;  %1116 = vmatpush.msra.mxu3 %v677_v13  ;;  %v178_v9 = vld [vmem:[#allocation2 + $0x70] sm:$0xff]  ;;  %v528_v12 = vld [vmem:[#allocation2 + $0xb60] sm:$0xff] }
  0xe2   :  { %1060 = vmatmul.f32.vlgmr.msra.gmra.mxu0 %v2122_v10  ;;  %1080 = vmatmul.f32.vlgmr.msra.gmra.mxu1 %v2124_v14  ;;  %v338_v11 = vld [vmem:[#allocation2 + $0x570] sm:$0xff]  ;;  %v688_v13 = vld [vmem:[#allocation2 + $0x1060] sm:$0xff] }
  0xe3   :  { %1124 = vmatpush.msrb.mxu0 %v318_v15  ;;  %1144 = vmatpush.msrb.mxu1 %v478_v16  ;;  %v168_v15 = vld [vmem:[#allocation2 + $0x20] sm:$0xff] }
  0xe4   :  { %1097 = vmatpush.msra.mxu2 %v507_v17  ;;  %1117 = vmatpush.msra.mxu3 %v667_v18  ;;  %v328_v16 = vld [vmem:[#allocation2 + $0x520] sm:$0xff]  ;;  %v518_v17 = vld [vmem:[#allocation2 + $0xb10] sm:$0xff] }
  0xe5   :  { %1125 = vmatpush.msrb.mxu0 %v308_v19  ;;  %1145 = vmatpush.msrb.mxu1 %v468_v20  ;;  %v678_v18 = vld [vmem:[#allocation2 + $0x1010] sm:$0xff]  ;;  %v319_v19 = vld [vmem:[#allocation2 + $0x4d8] sm:$0xff] }
  0xe6   :  { %1098 = vmatpush.msra.mxu2 %v497_v22  ;;  %1118 = vmatpush.msra.mxu3 %v657_v23  ;;  %v479_v20 = vld [vmem:[#allocation2 + $0x9d8] sm:$0xff]  ;;  %v508_v22 = vld [vmem:[#allocation2 + $0xac0] sm:$0xff] }
  0xe7   :  { %1126 = vmatpush.msrb.mxu0 %v298_v25  ;;  %1146 = vmatpush.msrb.mxu1 %v458_v26  ;;  %v668_v23 = vld [vmem:[#allocation2 + $0xfc0] sm:$0xff]  ;;  %v309_v25 = vld [vmem:[#allocation2 + $0x488] sm:$0xff] }
  0xe8   :  { %1099 = vmatpush.msra.mxu2 %v487_v27  ;;  %1119 = vmatpush.msra.mxu3 %v647_v28  ;;  %v469_v26 = vld [vmem:[#allocation2 + $0x988] sm:$0xff]  ;;  %v498_v27 = vld [vmem:[#allocation2 + $0xa70] sm:$0xff] }
  0xe9   :  { %1100 = vmatmul.f32.vlgmr.msra.gmra.mxu2 %v2128_v21  ;;  %1120 = vmatmul.f32.vlgmr.msra.gmra.mxu3 %v2130_v24  ;;  %v658_v28 = vld [vmem:[#allocation2 + $0xf70] sm:$0xff] }
  0xea   :  { %1127 = vmatpush.msrb.mxu0 %v288_v29  ;;  %1147 = vmatpush.msrb.mxu1 %v448_v30  ;;  %v299_v29 = vld [vmem:[#allocation2 + $0x438] sm:$0xff] }
  0xeb   :  { %1164 = vmatpush.msrb.mxu2 %v638_v31  ;;  %1184 = vmatpush.msrb.mxu3 %v798_v32  ;;  %v459_v30 = vld [vmem:[#allocation2 + $0x938] sm:$0xff]  ;;  %v488_v31 = vld [vmem:[#allocation2 + $0xa20] sm:$0xff] }
  0xec   :  { %1128 = vmatpush.msrb.mxu0 %v278_v33  ;;  %1148 = vmatpush.msrb.mxu1 %v438_v34  ;;  %v648_v32 = vld [vmem:[#allocation2 + $0xf20] sm:$0xff]  ;;  %v289_v33 = vld [vmem:[#allocation2 + $0x3e8] sm:$0xff] }
  0xed   :  { %1165 = vmatpush.msrb.mxu2 %v628_v35  ;;  %1185 = vmatpush.msrb.mxu3 %v788_v36  ;;  %v449_v34 = vld [vmem:[#allocation2 + $0x8e8] sm:$0xff]  ;;  %v639_v35 = vld [vmem:[#allocation2 + $0xed8] sm:$0xff] }
  0xee   :  { %1129 = vmatpush.msrb.mxu0 %v268_v37  ;;  %1149 = vmatpush.msrb.mxu1 %v428_v38  ;;  %v799_v36 = vld [vmem:[#allocation2 + $0x13d8] sm:$0xff] }
  0xef   :  { %1166 = vmatpush.msrb.mxu2 %v618_v39  ;;  %1186 = vmatpush.msrb.mxu3 %v778_v40  ;;  %v279_v37 = vld [vmem:[#allocation2 + $0x398] sm:$0xff]  ;;  %v629_v39 = vld [vmem:[#allocation2 + $0xe88] sm:$0xff] }
  0xf0   :  { %1130 = vmatpush.msrb.mxu0 %v258_v41  ;;  %1150 = vmatpush.msrb.mxu1 %v418_v42  ;;  %v439_v38 = vld [vmem:[#allocation2 + $0x898] sm:$0xff]  ;;  %v789_v40 = vld [vmem:[#allocation2 + $0x1388] sm:$0xff] }
  0xf1   :  { %1167 = vmatpush.msrb.mxu2 %v608_v43  ;;  %1187 = vmatpush.msrb.mxu3 %v768_v44  ;;  %v269_v41 = vld [vmem:[#allocation2 + $0x348] sm:$0xff]  ;;  %v619_v43 = vld [vmem:[#allocation2 + $0xe38] sm:$0xff] }
  0xf2   :  { %1131 = vmatpush.msrb.mxu0 %v248_v45  ;;  %1151 = vmatpush.msrb.mxu1 %v408_v46  ;;  %v429_v42 = vld [vmem:[#allocation2 + $0x848] sm:$0xff]  ;;  %v779_v44 = vld [vmem:[#allocation2 + $0x1338] sm:$0xff] }
  0xf3   :  { %1168 = vmatpush.msrb.mxu2 %v598_v47  ;;  %1188 = vmatpush.msrb.mxu3 %v758_v48  ;;  %v259_v45 = vld [vmem:[#allocation2 + $0x2f8] sm:$0xff]  ;;  %v609_v47 = vld [vmem:[#allocation2 + $0xde8] sm:$0xff] }
  0xf4   :  { %1132 = vmatpush.msrb.mxu0 %v238_v49  ;;  %1152 = vmatpush.msrb.mxu1 %v398_v50  ;;  %v419_v46 = vld [vmem:[#allocation2 + $0x7f8] sm:$0xff]  ;;  %v769_v48 = vld [vmem:[#allocation2 + $0x12e8] sm:$0xff] }
  0xf5   :  { %1169 = vmatpush.msrb.mxu2 %v588_v51  ;;  %1189 = vmatpush.msrb.mxu3 %v748_v52  ;;  %v249_v49 = vld [vmem:[#allocation2 + $0x2a8] sm:$0xff]  ;;  %v599_v51 = vld [vmem:[#allocation2 + $0xd98] sm:$0xff] }
  0xf6   :  { %1133 = vmatpush.msrb.mxu0 %v228_v53  ;;  %1153 = vmatpush.msrb.mxu1 %v388_v54  ;;  %v409_v50 = vld [vmem:[#allocation2 + $0x7a8] sm:$0xff]  ;;  %v759_v52 = vld [vmem:[#allocation2 + $0x1298] sm:$0xff] }
  0xf7   :  { %1170 = vmatpush.msrb.mxu2 %v578_v55  ;;  %1190 = vmatpush.msrb.mxu3 %v738_v56  ;;  %v239_v53 = vld [vmem:[#allocation2 + $0x258] sm:$0xff]  ;;  %v589_v55 = vld [vmem:[#allocation2 + $0xd48] sm:$0xff] }
  0xf8   :  { %1134 = vmatpush.msrb.mxu0 %v218_v57  ;;  %1154 = vmatpush.msrb.mxu1 %v378_v58  ;;  %v399_v54 = vld [vmem:[#allocation2 + $0x758] sm:$0xff]  ;;  %v749_v56 = vld [vmem:[#allocation2 + $0x1248] sm:$0xff] }
  0xf9   :  { %1171 = vmatpush.msrb.mxu2 %v568_v59  ;;  %1191 = vmatpush.msrb.mxu3 %v728_v60  ;;  %v229_v57 = vld [vmem:[#allocation2 + $0x208] sm:$0xff]  ;;  %v579_v59 = vld [vmem:[#allocation2 + $0xcf8] sm:$0xff] }
  0xfa   :  { %1135 = vmatpush.msrb.mxu0 %v208_v61  ;;  %1155 = vmatpush.msrb.mxu1 %v368_v62  ;;  %v389_v58 = vld [vmem:[#allocation2 + $0x708] sm:$0xff]  ;;  %v739_v60 = vld [vmem:[#allocation2 + $0x11f8] sm:$0xff] }
  0xfb   :  { %1172 = vmatpush.msrb.mxu2 %v558_v63  ;;  %1192 = vmatpush.msrb.mxu3 %v718_v0  ;;  %v219_v61 = vld [vmem:[#allocation2 + $0x1b8] sm:$0xff]  ;;  %v569_v63 = vld [vmem:[#allocation2 + $0xca8] sm:$0xff] }
  0xfc   :  { %1136 = vmatpush.msrb.mxu0 %v198_v1  ;;  %1156 = vmatpush.msrb.mxu1 %v358_v2  ;;  %v379_v62 = vld [vmem:[#allocation2 + $0x6b8] sm:$0xff]  ;;  %v729_v0 = vld [vmem:[#allocation2 + $0x11a8] sm:$0xff] }
  0xfd   :  { %1173 = vmatpush.msrb.mxu2 %v548_v3  ;;  %1193 = vmatpush.msrb.mxu3 %v708_v4  ;;  %v209_v1 = vld [vmem:[#allocation2 + $0x168] sm:$0xff]  ;;  %v559_v3 = vld [vmem:[#allocation2 + $0xc58] sm:$0xff] }
  0xfe   :  { %1137 = vmatpush.msrb.mxu0 %v188_v5  ;;  %1157 = vmatpush.msrb.mxu1 %v348_v6  ;;  %v369_v2 = vld [vmem:[#allocation2 + $0x668] sm:$0xff]  ;;  %v719_v4 = vld [vmem:[#allocation2 + $0x1158] sm:$0xff] }
  0xff   :  { %1174 = vmatpush.msrb.mxu2 %v538_v7  ;;  %1194 = vmatpush.msrb.mxu3 %v698_v8  ;;  %v199_v5 = vld [vmem:[#allocation2 + $0x118] sm:$0xff]  ;;  %v549_v7 = vld [vmem:[#allocation2 + $0xc08] sm:$0xff] }
 0x100   :  { %1138 = vmatpush.msrb.mxu0 %v178_v9  ;;  %1158 = vmatpush.msrb.mxu1 %v338_v11  ;;  %v359_v6 = vld [vmem:[#allocation2 + $0x618] sm:$0xff]  ;;  %v709_v8 = vld [vmem:[#allocation2 + $0x1108] sm:$0xff] }
 0x101   :  { %1175 = vmatpush.msrb.mxu2 %v528_v12  ;;  %1195 = vmatpush.msrb.mxu3 %v688_v13  ;;  %v189_v9 = vld [vmem:[#allocation2 + $0xc8] sm:$0xff]  ;;  %v539_v12 = vld [vmem:[#allocation2 + $0xbb8] sm:$0xff] }
 0x102   :  { %1139 = vmatpush.msrb.mxu0 %v168_v15  ;;  %1159 = vmatpush.msrb.mxu1 %v328_v16  ;;  %v349_v11 = vld [vmem:[#allocation2 + $0x5c8] sm:$0xff]  ;;  %v699_v13 = vld [vmem:[#allocation2 + $0x10b8] sm:$0xff] }
 0x103   :  { %1176 = vmatpush.msrb.mxu2 %v518_v17  ;;  %1196 = vmatpush.msrb.mxu3 %v678_v18  ;;  %v179_v15 = vld [vmem:[#allocation2 + $0x78] sm:$0xff]  ;;  %v529_v17 = vld [vmem:[#allocation2 + $0xb68] sm:$0xff] }
 0x104   :  { %1140 = vmatmul.f32.vlgmr.msrb.gmra.mxu0 %v2122_v10  ;;  %1160 = vmatmul.f32.vlgmr.msrb.gmra.mxu1 %v2124_v14  ;;  %v339_v16 = vld [vmem:[#allocation2 + $0x578] sm:$0xff]  ;;  %v689_v18 = vld [vmem:[#allocation2 + $0x1068] sm:$0xff] }
 0x105   :  { %1204 = vmatpush.msra.mxu0 %v319_v19  ;;  %1224 = vmatpush.msra.mxu1 %v479_v20  ;;  %v169_v19 = vld [vmem:[#allocation2 + $0x28] sm:$0xff] }
 0x106   :  { %1177 = vmatpush.msrb.mxu2 %v508_v22  ;;  %1197 = vmatpush.msrb.mxu3 %v668_v23  ;;  %v329_v20 = vld [vmem:[#allocation2 + $0x528] sm:$0xff]  ;;  %v519_v22 = vld [vmem:[#allocation2 + $0xb18] sm:$0xff] }
 0x107   :  { %1205 = vmatpush.msra.mxu0 %v309_v25  ;;  %1225 = vmatpush.msra.mxu1 %v469_v26  ;;  %v679_v23 = vld [vmem:[#allocation2 + $0x1018] sm:$0xff]  ;;  %v320_v25 = vld [vmem:[#allocation2 + $0x4e0] sm:$0xff] }
 0x108   :  { %1178 = vmatpush.msrb.mxu2 %v498_v27  ;;  %1198 = vmatpush.msrb.mxu3 %v658_v28  ;;  %v480_v26 = vld [vmem:[#allocation2 + $0x9e0] sm:$0xff]  ;;  %v509_v27 = vld [vmem:[#allocation2 + $0xac8] sm:$0xff] }
 0x109   :  { %1206 = vmatpush.msra.mxu0 %v299_v29  ;;  %1226 = vmatpush.msra.mxu1 %v459_v30  ;;  %v669_v28 = vld [vmem:[#allocation2 + $0xfc8] sm:$0xff]  ;;  %v310_v29 = vld [vmem:[#allocation2 + $0x490] sm:$0xff] }
 0x10a   :  { %1179 = vmatpush.msrb.mxu2 %v488_v31  ;;  %1199 = vmatpush.msrb.mxu3 %v648_v32  ;;  %v470_v30 = vld [vmem:[#allocation2 + $0x990] sm:$0xff]  ;;  %v499_v31 = vld [vmem:[#allocation2 + $0xa78] sm:$0xff] }
 0x10b   :  { %1180 = vmatmul.f32.vlgmr.msrb.gmra.mxu2 %v2128_v21  ;;  %1200 = vmatmul.f32.vlgmr.msrb.gmra.mxu3 %v2130_v24  ;;  %v659_v32 = vld [vmem:[#allocation2 + $0xf78] sm:$0xff] }
 0x10c   :  { %1207 = vmatpush.msra.mxu0 %v289_v33  ;;  %1227 = vmatpush.msra.mxu1 %v449_v34  ;;  %v300_v33 = vld [vmem:[#allocation2 + $0x440] sm:$0xff] }
 0x10d   :  { %1244 = vmatpush.msra.mxu2 %v639_v35  ;;  %1264 = vmatpush.msra.mxu3 %v799_v36  ;;  %v460_v34 = vld [vmem:[#allocation2 + $0x940] sm:$0xff]  ;;  %v489_v35 = vld [vmem:[#allocation2 + $0xa28] sm:$0xff] }
 0x10e   :  { %1208 = vmatpush.msra.mxu0 %v279_v37  ;;  %1228 = vmatpush.msra.mxu1 %v439_v38  ;;  %v649_v36 = vld [vmem:[#allocation2 + $0xf28] sm:$0xff]  ;;  %v290_v37 = vld [vmem:[#allocation2 + $0x3f0] sm:$0xff] }
 0x10f   :  { %1245 = vmatpush.msra.mxu2 %v629_v39  ;;  %1265 = vmatpush.msra.mxu3 %v789_v40  ;;  %v450_v38 = vld [vmem:[#allocation2 + $0x8f0] sm:$0xff]  ;;  %v640_v39 = vld [vmem:[#allocation2 + $0xee0] sm:$0xff] }
 0x110   :  { %1209 = vmatpush.msra.mxu0 %v269_v41  ;;  %1229 = vmatpush.msra.mxu1 %v429_v42  ;;  %v800_v40 = vld [vmem:[#allocation2 + $0x13e0] sm:$0xff] }
 0x111   :  { %1246 = vmatpush.msra.mxu2 %v619_v43  ;;  %1266 = vmatpush.msra.mxu3 %v779_v44  ;;  %v280_v41 = vld [vmem:[#allocation2 + $0x3a0] sm:$0xff]  ;;  %v630_v43 = vld [vmem:[#allocation2 + $0xe90] sm:$0xff] }
 0x112   :  { %1210 = vmatpush.msra.mxu0 %v259_v45  ;;  %1230 = vmatpush.msra.mxu1 %v419_v46  ;;  %v440_v42 = vld [vmem:[#allocation2 + $0x8a0] sm:$0xff]  ;;  %v790_v44 = vld [vmem:[#allocation2 + $0x1390] sm:$0xff] }
 0x113   :  { %1247 = vmatpush.msra.mxu2 %v609_v47  ;;  %1267 = vmatpush.msra.mxu3 %v769_v48  ;;  %v270_v45 = vld [vmem:[#allocation2 + $0x350] sm:$0xff]  ;;  %v620_v47 = vld [vmem:[#allocation2 + $0xe40] sm:$0xff] }
 0x114   :  { %1211 = vmatpush.msra.mxu0 %v249_v49  ;;  %1231 = vmatpush.msra.mxu1 %v409_v50  ;;  %v430_v46 = vld [vmem:[#allocation2 + $0x850] sm:$0xff]  ;;  %v780_v48 = vld [vmem:[#allocation2 + $0x1340] sm:$0xff] }
 0x115   :  { %1248 = vmatpush.msra.mxu2 %v599_v51  ;;  %1268 = vmatpush.msra.mxu3 %v759_v52  ;;  %v260_v49 = vld [vmem:[#allocation2 + $0x300] sm:$0xff]  ;;  %v610_v51 = vld [vmem:[#allocation2 + $0xdf0] sm:$0xff] }
 0x116   :  { %1212 = vmatpush.msra.mxu0 %v239_v53  ;;  %1232 = vmatpush.msra.mxu1 %v399_v54  ;;  %v420_v50 = vld [vmem:[#allocation2 + $0x800] sm:$0xff]  ;;  %v770_v52 = vld [vmem:[#allocation2 + $0x12f0] sm:$0xff] }
 0x117   :  { %1249 = vmatpush.msra.mxu2 %v589_v55  ;;  %1269 = vmatpush.msra.mxu3 %v749_v56  ;;  %v250_v53 = vld [vmem:[#allocation2 + $0x2b0] sm:$0xff]  ;;  %v600_v55 = vld [vmem:[#allocation2 + $0xda0] sm:$0xff] }
 0x118   :  { %1213 = vmatpush.msra.mxu0 %v229_v57  ;;  %1233 = vmatpush.msra.mxu1 %v389_v58  ;;  %v410_v54 = vld [vmem:[#allocation2 + $0x7b0] sm:$0xff]  ;;  %v760_v56 = vld [vmem:[#allocation2 + $0x12a0] sm:$0xff] }
 0x119   :  { %1250 = vmatpush.msra.mxu2 %v579_v59  ;;  %1270 = vmatpush.msra.mxu3 %v739_v60  ;;  %v240_v57 = vld [vmem:[#allocation2 + $0x260] sm:$0xff]  ;;  %v590_v59 = vld [vmem:[#allocation2 + $0xd50] sm:$0xff] }
 0x11a   :  { %1214 = vmatpush.msra.mxu0 %v219_v61  ;;  %1234 = vmatpush.msra.mxu1 %v379_v62  ;;  %v400_v58 = vld [vmem:[#allocation2 + $0x760] sm:$0xff]  ;;  %v750_v60 = vld [vmem:[#allocation2 + $0x1250] sm:$0xff] }
 0x11b   :  { %1251 = vmatpush.msra.mxu2 %v569_v63  ;;  %1271 = vmatpush.msra.mxu3 %v729_v0  ;;  %v230_v61 = vld [vmem:[#allocation2 + $0x210] sm:$0xff]  ;;  %v580_v63 = vld [vmem:[#allocation2 + $0xd00] sm:$0xff] }
 0x11c   :  { %1215 = vmatpush.msra.mxu0 %v209_v1  ;;  %1235 = vmatpush.msra.mxu1 %v369_v2  ;;  %v390_v62 = vld [vmem:[#allocation2 + $0x710] sm:$0xff]  ;;  %v740_v0 = vld [vmem:[#allocation2 + $0x1200] sm:$0xff] }
 0x11d   :  { %1252 = vmatpush.msra.mxu2 %v559_v3  ;;  %1272 = vmatpush.msra.mxu3 %v719_v4  ;;  %v220_v1 = vld [vmem:[#allocation2 + $0x1c0] sm:$0xff]  ;;  %v570_v3 = vld [vmem:[#allocation2 + $0xcb0] sm:$0xff] }
 0x11e   :  { %1216 = vmatpush.msra.mxu0 %v199_v5  ;;  %1236 = vmatpush.msra.mxu1 %v359_v6  ;;  %v380_v2 = vld [vmem:[#allocation2 + $0x6c0] sm:$0xff]  ;;  %v730_v4 = vld [vmem:[#allocation2 + $0x11b0] sm:$0xff] }
 0x11f   :  { %1253 = vmatpush.msra.mxu2 %v549_v7  ;;  %1273 = vmatpush.msra.mxu3 %v709_v8  ;;  %v210_v5 = vld [vmem:[#allocation2 + $0x170] sm:$0xff]  ;;  %v560_v7 = vld [vmem:[#allocation2 + $0xc60] sm:$0xff] }
 0x120   :  { %1217 = vmatpush.msra.mxu0 %v189_v9  ;;  %1237 = vmatpush.msra.mxu1 %v349_v11  ;;  %v370_v6 = vld [vmem:[#allocation2 + $0x670] sm:$0xff]  ;;  %v720_v8 = vld [vmem:[#allocation2 + $0x1160] sm:$0xff] }
 0x121   :  { %1254 = vmatpush.msra.mxu2 %v539_v12  ;;  %1274 = vmatpush.msra.mxu3 %v699_v13  ;;  %v200_v9 = vld [vmem:[#allocation2 + $0x120] sm:$0xff]  ;;  %v550_v12 = vld [vmem:[#allocation2 + $0xc10] sm:$0xff] }
 0x122   :  { %1218 = vmatpush.msra.mxu0 %v179_v15  ;;  %1238 = vmatpush.msra.mxu1 %v339_v16  ;;  %v360_v11 = vld [vmem:[#allocation2 + $0x620] sm:$0xff]  ;;  %v710_v13 = vld [vmem:[#allocation2 + $0x1110] sm:$0xff] }
 0x123   :  { %1255 = vmatpush.msra.mxu2 %v529_v17  ;;  %1275 = vmatpush.msra.mxu3 %v689_v18  ;;  %v190_v15 = vld [vmem:[#allocation2 + $0xd0] sm:$0xff]  ;;  %v540_v17 = vld [vmem:[#allocation2 + $0xbc0] sm:$0xff] }
 0x124   :  { %1219 = vmatpush.msra.mxu0 %v169_v19  ;;  %1239 = vmatpush.msra.mxu1 %v329_v20  ;;  %v350_v16 = vld [vmem:[#allocation2 + $0x5d0] sm:$0xff]  ;;  %v700_v18 = vld [vmem:[#allocation2 + $0x10c0] sm:$0xff] }
 0x125   :  { %1256 = vmatpush.msra.mxu2 %v519_v22  ;;  %1276 = vmatpush.msra.mxu3 %v679_v23  ;;  %v180_v19 = vld [vmem:[#allocation2 + $0x80] sm:$0xff]  ;;  %v530_v22 = vld [vmem:[#allocation2 + $0xb70] sm:$0xff] }
 0x126   :  { %1220 = vmatmul.f32.vlgmr.msra.gmra.mxu0 %v2122_v10  ;;  %1240 = vmatmul.f32.vlgmr.msra.gmra.mxu1 %v2124_v14  ;;  %v340_v20 = vld [vmem:[#allocation2 + $0x580] sm:$0xff]  ;;  %v690_v23 = vld [vmem:[#allocation2 + $0x1070] sm:$0xff] }
 0x127   :  { %1284 = vmatpush.msrb.mxu0 %v320_v25  ;;  %1304 = vmatpush.msrb.mxu1 %v480_v26  ;;  %v170_v25 = vld [vmem:[#allocation2 + $0x30] sm:$0xff] }
 0x128   :  { %1257 = vmatpush.msra.mxu2 %v509_v27  ;;  %1277 = vmatpush.msra.mxu3 %v669_v28  ;;  %v330_v26 = vld [vmem:[#allocation2 + $0x530] sm:$0xff]  ;;  %v520_v27 = vld [vmem:[#allocation2 + $0xb20] sm:$0xff] }
 0x129   :  { %1285 = vmatpush.msrb.mxu0 %v310_v29  ;;  %1305 = vmatpush.msrb.mxu1 %v470_v30  ;;  %v680_v28 = vld [vmem:[#allocation2 + $0x1020] sm:$0xff]  ;;  %v321_v29 = vld [vmem:[#allocation2 + $0x4e8] sm:$0xff] }
 0x12a   :  { %1258 = vmatpush.msra.mxu2 %v499_v31  ;;  %1278 = vmatpush.msra.mxu3 %v659_v32  ;;  %v481_v30 = vld [vmem:[#allocation2 + $0x9e8] sm:$0xff]  ;;  %v510_v31 = vld [vmem:[#allocation2 + $0xad0] sm:$0xff] }
 0x12b   :  { %1286 = vmatpush.msrb.mxu0 %v300_v33  ;;  %1306 = vmatpush.msrb.mxu1 %v460_v34  ;;  %v670_v32 = vld [vmem:[#allocation2 + $0xfd0] sm:$0xff]  ;;  %v311_v33 = vld [vmem:[#allocation2 + $0x498] sm:$0xff] }
 0x12c   :  { %1259 = vmatpush.msra.mxu2 %v489_v35  ;;  %1279 = vmatpush.msra.mxu3 %v649_v36  ;;  %v471_v34 = vld [vmem:[#allocation2 + $0x998] sm:$0xff]  ;;  %v500_v35 = vld [vmem:[#allocation2 + $0xa80] sm:$0xff] }
 0x12d   :  { %1260 = vmatmul.f32.vlgmr.msra.gmra.mxu2 %v2128_v21  ;;  %1280 = vmatmul.f32.vlgmr.msra.gmra.mxu3 %v2130_v24  ;;  %v660_v36 = vld [vmem:[#allocation2 + $0xf80] sm:$0xff] }
 0x12e   :  { %1287 = vmatpush.msrb.mxu0 %v290_v37  ;;  %1307 = vmatpush.msrb.mxu1 %v450_v38  ;;  %v301_v37 = vld [vmem:[#allocation2 + $0x448] sm:$0xff] }
 0x12f   :  { %1324 = vmatpush.msrb.mxu2 %v640_v39  ;;  %1344 = vmatpush.msrb.mxu3 %v800_v40  ;;  %v461_v38 = vld [vmem:[#allocation2 + $0x948] sm:$0xff]  ;;  %v490_v39 = vld [vmem:[#allocation2 + $0xa30] sm:$0xff] }
 0x130   :  { %1288 = vmatpush.msrb.mxu0 %v280_v41  ;;  %1308 = vmatpush.msrb.mxu1 %v440_v42  ;;  %v650_v40 = vld [vmem:[#allocation2 + $0xf30] sm:$0xff]  ;;  %v291_v41 = vld [vmem:[#allocation2 + $0x3f8] sm:$0xff] }
 0x131   :  { %1325 = vmatpush.msrb.mxu2 %v630_v43  ;;  %1345 = vmatpush.msrb.mxu3 %v790_v44  ;;  %v451_v42 = vld [vmem:[#allocation2 + $0x8f8] sm:$0xff]  ;;  %v641_v43 = vld [vmem:[#allocation2 + $0xee8] sm:$0xff] }
 0x132   :  { %1289 = vmatpush.msrb.mxu0 %v270_v45  ;;  %1309 = vmatpush.msrb.mxu1 %v430_v46  ;;  %v801_v44 = vld [vmem:[#allocation2 + $0x13e8] sm:$0xff] }
 0x133   :  { %1326 = vmatpush.msrb.mxu2 %v620_v47  ;;  %1346 = vmatpush.msrb.mxu3 %v780_v48  ;;  %v281_v45 = vld [vmem:[#allocation2 + $0x3a8] sm:$0xff]  ;;  %v631_v47 = vld [vmem:[#allocation2 + $0xe98] sm:$0xff] }
 0x134   :  { %1290 = vmatpush.msrb.mxu0 %v260_v49  ;;  %1310 = vmatpush.msrb.mxu1 %v420_v50  ;;  %v441_v46 = vld [vmem:[#allocation2 + $0x8a8] sm:$0xff]  ;;  %v791_v48 = vld [vmem:[#allocation2 + $0x1398] sm:$0xff] }
 0x135   :  { %1327 = vmatpush.msrb.mxu2 %v610_v51  ;;  %1347 = vmatpush.msrb.mxu3 %v770_v52  ;;  %v271_v49 = vld [vmem:[#allocation2 + $0x358] sm:$0xff]  ;;  %v621_v51 = vld [vmem:[#allocation2 + $0xe48] sm:$0xff] }
 0x136   :  { %1291 = vmatpush.msrb.mxu0 %v250_v53  ;;  %1311 = vmatpush.msrb.mxu1 %v410_v54  ;;  %v431_v50 = vld [vmem:[#allocation2 + $0x858] sm:$0xff]  ;;  %v781_v52 = vld [vmem:[#allocation2 + $0x1348] sm:$0xff] }
 0x137   :  { %1328 = vmatpush.msrb.mxu2 %v600_v55  ;;  %1348 = vmatpush.msrb.mxu3 %v760_v56  ;;  %v261_v53 = vld [vmem:[#allocation2 + $0x308] sm:$0xff]  ;;  %v611_v55 = vld [vmem:[#allocation2 + $0xdf8] sm:$0xff] }
 0x138   :  { %1292 = vmatpush.msrb.mxu0 %v240_v57  ;;  %1312 = vmatpush.msrb.mxu1 %v400_v58  ;;  %v421_v54 = vld [vmem:[#allocation2 + $0x808] sm:$0xff]  ;;  %v771_v56 = vld [vmem:[#allocation2 + $0x12f8] sm:$0xff] }
 0x139   :  { %1329 = vmatpush.msrb.mxu2 %v590_v59  ;;  %1349 = vmatpush.msrb.mxu3 %v750_v60  ;;  %v251_v57 = vld [vmem:[#allocation2 + $0x2b8] sm:$0xff]  ;;  %v601_v59 = vld [vmem:[#allocation2 + $0xda8] sm:$0xff] }
 0x13a   :  { %1293 = vmatpush.msrb.mxu0 %v230_v61  ;;  %1313 = vmatpush.msrb.mxu1 %v390_v62  ;;  %v411_v58 = vld [vmem:[#allocation2 + $0x7b8] sm:$0xff]  ;;  %v761_v60 = vld [vmem:[#allocation2 + $0x12a8] sm:$0xff] }
 0x13b   :  { %1330 = vmatpush.msrb.mxu2 %v580_v63  ;;  %1350 = vmatpush.msrb.mxu3 %v740_v0  ;;  %v241_v61 = vld [vmem:[#allocation2 + $0x268] sm:$0xff]  ;;  %v591_v63 = vld [vmem:[#allocation2 + $0xd58] sm:$0xff] }
 0x13c   :  { %1294 = vmatpush.msrb.mxu0 %v220_v1  ;;  %1314 = vmatpush.msrb.mxu1 %v380_v2  ;;  %v401_v62 = vld [vmem:[#allocation2 + $0x768] sm:$0xff]  ;;  %v751_v0 = vld [vmem:[#allocation2 + $0x1258] sm:$0xff] }
 0x13d   :  { %1331 = vmatpush.msrb.mxu2 %v570_v3  ;;  %1351 = vmatpush.msrb.mxu3 %v730_v4  ;;  %v231_v1 = vld [vmem:[#allocation2 + $0x218] sm:$0xff]  ;;  %v581_v3 = vld [vmem:[#allocation2 + $0xd08] sm:$0xff] }
 0x13e   :  { %1295 = vmatpush.msrb.mxu0 %v210_v5  ;;  %1315 = vmatpush.msrb.mxu1 %v370_v6  ;;  %v391_v2 = vld [vmem:[#allocation2 + $0x718] sm:$0xff]  ;;  %v741_v4 = vld [vmem:[#allocation2 + $0x1208] sm:$0xff] }
 0x13f   :  { %1332 = vmatpush.msrb.mxu2 %v560_v7  ;;  %1352 = vmatpush.msrb.mxu3 %v720_v8  ;;  %v221_v5 = vld [vmem:[#allocation2 + $0x1c8] sm:$0xff]  ;;  %v571_v7 = vld [vmem:[#allocation2 + $0xcb8] sm:$0xff] }
 0x140   :  { %1296 = vmatpush.msrb.mxu0 %v200_v9  ;;  %1316 = vmatpush.msrb.mxu1 %v360_v11  ;;  %v381_v6 = vld [vmem:[#allocation2 + $0x6c8] sm:$0xff]  ;;  %v731_v8 = vld [vmem:[#allocation2 + $0x11b8] sm:$0xff] }
 0x141   :  { %1333 = vmatpush.msrb.mxu2 %v550_v12  ;;  %1353 = vmatpush.msrb.mxu3 %v710_v13  ;;  %v211_v9 = vld [vmem:[#allocation2 + $0x178] sm:$0xff]  ;;  %v561_v12 = vld [vmem:[#allocation2 + $0xc68] sm:$0xff] }
 0x142   :  { %1297 = vmatpush.msrb.mxu0 %v190_v15  ;;  %1317 = vmatpush.msrb.mxu1 %v350_v16  ;;  %v371_v11 = vld [vmem:[#allocation2 + $0x678] sm:$0xff]  ;;  %v721_v13 = vld [vmem:[#allocation2 + $0x1168] sm:$0xff] }
 0x143   :  { %1334 = vmatpush.msrb.mxu2 %v540_v17  ;;  %1354 = vmatpush.msrb.mxu3 %v700_v18  ;;  %v201_v15 = vld [vmem:[#allocation2 + $0x128] sm:$0xff]  ;;  %v551_v17 = vld [vmem:[#allocation2 + $0xc18] sm:$0xff] }
 0x144   :  { %1298 = vmatpush.msrb.mxu0 %v180_v19  ;;  %1318 = vmatpush.msrb.mxu1 %v340_v20  ;;  %v361_v16 = vld [vmem:[#allocation2 + $0x628] sm:$0xff]  ;;  %v711_v18 = vld [vmem:[#allocation2 + $0x1118] sm:$0xff] }
 0x145   :  { %1335 = vmatpush.msrb.mxu2 %v530_v22  ;;  %1355 = vmatpush.msrb.mxu3 %v690_v23  ;;  %v191_v19 = vld [vmem:[#allocation2 + $0xd8] sm:$0xff]  ;;  %v541_v22 = vld [vmem:[#allocation2 + $0xbc8] sm:$0xff] }
 0x146   :  { %1299 = vmatpush.msrb.mxu0 %v170_v25  ;;  %1319 = vmatpush.msrb.mxu1 %v330_v26  ;;  %v351_v20 = vld [vmem:[#allocation2 + $0x5d8] sm:$0xff]  ;;  %v701_v23 = vld [vmem:[#allocation2 + $0x10c8] sm:$0xff] }
 0x147   :  { %1336 = vmatpush.msrb.mxu2 %v520_v27  ;;  %1356 = vmatpush.msrb.mxu3 %v680_v28  ;;  %v181_v25 = vld [vmem:[#allocation2 + $0x88] sm:$0xff]  ;;  %v531_v27 = vld [vmem:[#allocation2 + $0xb78] sm:$0xff] }
 0x148   :  { %1300 = vmatmul.f32.vlgmr.msrb.gmra.mxu0 %v2122_v10  ;;  %1320 = vmatmul.f32.vlgmr.msrb.gmra.mxu1 %v2124_v14  ;;  %v341_v26 = vld [vmem:[#allocation2 + $0x588] sm:$0xff]  ;;  %v691_v28 = vld [vmem:[#allocation2 + $0x1078] sm:$0xff] }
 0x149   :  { %1364 = vmatpush.msra.mxu0 %v321_v29  ;;  %1384 = vmatpush.msra.mxu1 %v481_v30  ;;  %v171_v29 = vld [vmem:[#allocation2 + $0x38] sm:$0xff] }
 0x14a   :  { %1337 = vmatpush.msrb.mxu2 %v510_v31  ;;  %1357 = vmatpush.msrb.mxu3 %v670_v32  ;;  %v331_v30 = vld [vmem:[#allocation2 + $0x538] sm:$0xff]  ;;  %v521_v31 = vld [vmem:[#allocation2 + $0xb28] sm:$0xff] }
 0x14b   :  { %1365 = vmatpush.msra.mxu0 %v311_v33  ;;  %1385 = vmatpush.msra.mxu1 %v471_v34  ;;  %v681_v32 = vld [vmem:[#allocation2 + $0x1028] sm:$0xff]  ;;  %v322_v33 = vld [vmem:[#allocation2 + $0x4f0] sm:$0xff] }
 0x14c   :  { %1338 = vmatpush.msrb.mxu2 %v500_v35  ;;  %1358 = vmatpush.msrb.mxu3 %v660_v36  ;;  %v482_v34 = vld [vmem:[#allocation2 + $0x9f0] sm:$0xff]  ;;  %v511_v35 = vld [vmem:[#allocation2 + $0xad8] sm:$0xff] }
 0x14d   :  { %1366 = vmatpush.msra.mxu0 %v301_v37  ;;  %1386 = vmatpush.msra.mxu1 %v461_v38  ;;  %v671_v36 = vld [vmem:[#allocation2 + $0xfd8] sm:$0xff]  ;;  %v312_v37 = vld [vmem:[#allocation2 + $0x4a0] sm:$0xff] }
 0x14e   :  { %1339 = vmatpush.msrb.mxu2 %v490_v39  ;;  %1359 = vmatpush.msrb.mxu3 %v650_v40  ;;  %v472_v38 = vld [vmem:[#allocation2 + $0x9a0] sm:$0xff]  ;;  %v501_v39 = vld [vmem:[#allocation2 + $0xa88] sm:$0xff] }
 0x14f   :  { %1340 = vmatmul.f32.vlgmr.msrb.gmra.mxu2 %v2128_v21  ;;  %1360 = vmatmul.f32.vlgmr.msrb.gmra.mxu3 %v2130_v24  ;;  %v661_v40 = vld [vmem:[#allocation2 + $0xf88] sm:$0xff] }
 0x150   :  { %1367 = vmatpush.msra.mxu0 %v291_v41  ;;  %1387 = vmatpush.msra.mxu1 %v451_v42  ;;  %v302_v41 = vld [vmem:[#allocation2 + $0x450] sm:$0xff] }
 0x151   :  { %1404 = vmatpush.msra.mxu2 %v641_v43  ;;  %1424 = vmatpush.msra.mxu3 %v801_v44  ;;  %v462_v42 = vld [vmem:[#allocation2 + $0x950] sm:$0xff]  ;;  %v491_v43 = vld [vmem:[#allocation2 + $0xa38] sm:$0xff] }
 0x152   :  { %1368 = vmatpush.msra.mxu0 %v281_v45  ;;  %1388 = vmatpush.msra.mxu1 %v441_v46  ;;  %v651_v44 = vld [vmem:[#allocation2 + $0xf38] sm:$0xff]  ;;  %v292_v45 = vld [vmem:[#allocation2 + $0x400] sm:$0xff] }
 0x153   :  { %1405 = vmatpush.msra.mxu2 %v631_v47  ;;  %1425 = vmatpush.msra.mxu3 %v791_v48  ;;  %v452_v46 = vld [vmem:[#allocation2 + $0x900] sm:$0xff]  ;;  %v642_v47 = vld [vmem:[#allocation2 + $0xef0] sm:$0xff] }
 0x154   :  { %1369 = vmatpush.msra.mxu0 %v271_v49  ;;  %1389 = vmatpush.msra.mxu1 %v431_v50  ;;  %v802_v48 = vld [vmem:[#allocation2 + $0x13f0] sm:$0xff] }
 0x155   :  { %1406 = vmatpush.msra.mxu2 %v621_v51  ;;  %1426 = vmatpush.msra.mxu3 %v781_v52  ;;  %v282_v49 = vld [vmem:[#allocation2 + $0x3b0] sm:$0xff]  ;;  %v632_v51 = vld [vmem:[#allocation2 + $0xea0] sm:$0xff] }
 0x156   :  { %1370 = vmatpush.msra.mxu0 %v261_v53  ;;  %1390 = vmatpush.msra.mxu1 %v421_v54  ;;  %v442_v50 = vld [vmem:[#allocation2 + $0x8b0] sm:$0xff]  ;;  %v792_v52 = vld [vmem:[#allocation2 + $0x13a0] sm:$0xff] }
 0x157   :  { %1407 = vmatpush.msra.mxu2 %v611_v55  ;;  %1427 = vmatpush.msra.mxu3 %v771_v56  ;;  %v272_v53 = vld [vmem:[#allocation2 + $0x360] sm:$0xff]  ;;  %v622_v55 = vld [vmem:[#allocation2 + $0xe50] sm:$0xff] }
 0x158   :  { %1371 = vmatpush.msra.mxu0 %v251_v57  ;;  %1391 = vmatpush.msra.mxu1 %v411_v58  ;;  %v432_v54 = vld [vmem:[#allocation2 + $0x860] sm:$0xff]  ;;  %v782_v56 = vld [vmem:[#allocation2 + $0x1350] sm:$0xff] }
 0x159   :  { %1408 = vmatpush.msra.mxu2 %v601_v59  ;;  %1428 = vmatpush.msra.mxu3 %v761_v60  ;;  %v262_v57 = vld [vmem:[#allocation2 + $0x310] sm:$0xff]  ;;  %v612_v59 = vld [vmem:[#allocation2 + $0xe00] sm:$0xff] }
 0x15a   :  { %1372 = vmatpush.msra.mxu0 %v241_v61  ;;  %1392 = vmatpush.msra.mxu1 %v401_v62  ;;  %v422_v58 = vld [vmem:[#allocation2 + $0x810] sm:$0xff]  ;;  %v772_v60 = vld [vmem:[#allocation2 + $0x1300] sm:$0xff] }
 0x15b   :  { %1409 = vmatpush.msra.mxu2 %v591_v63  ;;  %1429 = vmatpush.msra.mxu3 %v751_v0  ;;  %v252_v61 = vld [vmem:[#allocation2 + $0x2c0] sm:$0xff]  ;;  %v602_v63 = vld [vmem:[#allocation2 + $0xdb0] sm:$0xff] }
 0x15c   :  { %1373 = vmatpush.msra.mxu0 %v231_v1  ;;  %1393 = vmatpush.msra.mxu1 %v391_v2  ;;  %v412_v62 = vld [vmem:[#allocation2 + $0x7c0] sm:$0xff]  ;;  %v762_v0 = vld [vmem:[#allocation2 + $0x12b0] sm:$0xff] }
 0x15d   :  { %1410 = vmatpush.msra.mxu2 %v581_v3  ;;  %1430 = vmatpush.msra.mxu3 %v741_v4  ;;  %v242_v1 = vld [vmem:[#allocation2 + $0x270] sm:$0xff]  ;;  %v592_v3 = vld [vmem:[#allocation2 + $0xd60] sm:$0xff] }
 0x15e   :  { %1374 = vmatpush.msra.mxu0 %v221_v5  ;;  %1394 = vmatpush.msra.mxu1 %v381_v6  ;;  %v402_v2 = vld [vmem:[#allocation2 + $0x770] sm:$0xff]  ;;  %v752_v4 = vld [vmem:[#allocation2 + $0x1260] sm:$0xff] }
 0x15f   :  { %1411 = vmatpush.msra.mxu2 %v571_v7  ;;  %1431 = vmatpush.msra.mxu3 %v731_v8  ;;  %v232_v5 = vld [vmem:[#allocation2 + $0x220] sm:$0xff]  ;;  %v582_v7 = vld [vmem:[#allocation2 + $0xd10] sm:$0xff] }
 0x160   :  { %1375 = vmatpush.msra.mxu0 %v211_v9  ;;  %1395 = vmatpush.msra.mxu1 %v371_v11  ;;  %v392_v6 = vld [vmem:[#allocation2 + $0x720] sm:$0xff]  ;;  %v742_v8 = vld [vmem:[#allocation2 + $0x1210] sm:$0xff] }
 0x161   :  { %1412 = vmatpush.msra.mxu2 %v561_v12  ;;  %1432 = vmatpush.msra.mxu3 %v721_v13  ;;  %v222_v9 = vld [vmem:[#allocation2 + $0x1d0] sm:$0xff]  ;;  %v572_v12 = vld [vmem:[#allocation2 + $0xcc0] sm:$0xff] }
 0x162   :  { %1376 = vmatpush.msra.mxu0 %v201_v15  ;;  %1396 = vmatpush.msra.mxu1 %v361_v16  ;;  %v382_v11 = vld [vmem:[#allocation2 + $0x6d0] sm:$0xff]  ;;  %v732_v13 = vld [vmem:[#allocation2 + $0x11c0] sm:$0xff] }
 0x163   :  { %1413 = vmatpush.msra.mxu2 %v551_v17  ;;  %1433 = vmatpush.msra.mxu3 %v711_v18  ;;  %v212_v15 = vld [vmem:[#allocation2 + $0x180] sm:$0xff]  ;;  %v562_v17 = vld [vmem:[#allocation2 + $0xc70] sm:$0xff] }
 0x164   :  { %1377 = vmatpush.msra.mxu0 %v191_v19  ;;  %1397 = vmatpush.msra.mxu1 %v351_v20  ;;  %v372_v16 = vld [vmem:[#allocation2 + $0x680] sm:$0xff]  ;;  %v722_v18 = vld [vmem:[#allocation2 + $0x1170] sm:$0xff] }
 0x165   :  { %1414 = vmatpush.msra.mxu2 %v541_v22  ;;  %1434 = vmatpush.msra.mxu3 %v701_v23  ;;  %v202_v19 = vld [vmem:[#allocation2 + $0x130] sm:$0xff]  ;;  %v2162_v22 = vpop.f32.mrf.mxu0  ;;  %v2164_v23 = vpop.f32.mrf.mxu1 }
 0x166   :  { %1378 = vmatpush.msra.mxu0 %v181_v25  ;;  %1398 = vmatpush.msra.mxu1 %v341_v26  ;;  %v362_v20 = vld [vmem:[#allocation2 + $0x630] sm:$0xff]  ;;  %v552_v25 = vld [vmem:[#allocation2 + $0xc20] sm:$0xff] }
 0x167   :  { %1415 = vmatpush.msra.mxu2 %v531_v27  ;;  %1435 = vmatpush.msra.mxu3 %v691_v28  ;;  %v712_v26 = vld [vmem:[#allocation2 + $0x1120] sm:$0xff] }
 0x168   :  { %1379 = vmatpush.msra.mxu0 %v171_v29  ;;  %1399 = vmatpush.msra.mxu1 %v331_v30  ;;  %v192_v27 = vld [vmem:[#allocation2 + $0xe0] sm:$0xff]  ;;  %v542_v29 = vld [vmem:[#allocation2 + $0xbd0] sm:$0xff] }
 0x169   :  { %1416 = vmatpush.msra.mxu2 %v521_v31  ;;  %1436 = vmatpush.msra.mxu3 %v681_v32  ;;  %v352_v28 = vld [vmem:[#allocation2 + $0x5e0] sm:$0xff]  ;;  %v702_v30 = vld [vmem:[#allocation2 + $0x10d0] sm:$0xff] }
 0x16a   :  { %1380 = vmatmul.f32.vlgmr.msra.gmra.mxu0 %v2122_v10  ;;  %1400 = vmatmul.f32.vlgmr.msra.gmra.mxu1 %v2124_v14  ;;  %v182_v31 = vld [vmem:[#allocation2 + $0x90] sm:$0xff] }
 0x16b   :  { %1444 = vmatpush.msrb.mxu0 %v322_v33  ;;  %1464 = vmatpush.msrb.mxu1 %v482_v34  ;;  %v342_v32 = vld [vmem:[#allocation2 + $0x590] sm:$0xff]  ;;  %v2166_v33 = vpop.f32.mrf.mxu2  ;;  %v532_v34 = vld [vmem:[#allocation2 + $0xb80] sm:$0xff] }
 0x16c   :  { %1417 = vmatpush.msra.mxu2 %v511_v35  ;;  %1437 = vmatpush.msra.mxu3 %v671_v36  ;;  %v692_v35 = vld [vmem:[#allocation2 + $0x1080] sm:$0xff] }
 0x16d   :  { %1445 = vmatpush.msrb.mxu0 %v312_v37  ;;  %1465 = vmatpush.msrb.mxu1 %v472_v38  ;;  %v172_v36 = vld [vmem:[#allocation2 + $0x40] sm:$0xff]  ;;  %v2168_v38 = vpop.f32.mrf.mxu3 }
 0x16e   :  { %1418 = vmatpush.msra.mxu2 %v501_v39  ;;  %1438 = vmatpush.msra.mxu3 %v661_v40  ;;  %v332_v37 = vld [vmem:[#allocation2 + $0x540] sm:$0xff]  ;;  %v522_v39 = vld [vmem:[#allocation2 + $0xb30] sm:$0xff] }
 0x16f   :  { %1446 = vmatpush.msrb.mxu0 %v302_v41  ;;  %1466 = vmatpush.msrb.mxu1 %v462_v42  ;;  %v682_v40 = vld [vmem:[#allocation2 + $0x1030] sm:$0xff]  ;;  %v323_v41 = vld [vmem:[#allocation2 + $0x4f8] sm:$0xff] }
 0x170   :  { %1419 = vmatpush.msra.mxu2 %v491_v43  ;;  %1439 = vmatpush.msra.mxu3 %v651_v44  ;;  %v483_v42 = vld [vmem:[#allocation2 + $0x9f8] sm:$0xff]  ;;  %v512_v43 = vld [vmem:[#allocation2 + $0xae0] sm:$0xff] }
 0x171   :  { %1420 = vmatmul.f32.vlgmr.msra.gmra.mxu2 %v2128_v21  ;;  %1440 = vmatmul.f32.vlgmr.msra.gmra.mxu3 %v2130_v24  ;;  %v672_v44 = vld [vmem:[#allocation2 + $0xfe0] sm:$0xff] }
 0x172   :  { %1447 = vmatpush.msrb.mxu0 %v292_v45  ;;  %1467 = vmatpush.msrb.mxu1 %v452_v46  ;;  %v2170_v45 = vpop.f32.mrf.mxu0  ;;  %v2172_v46 = vpop.f32.mrf.mxu1 }
 0x173   :  { %1484 = vmatpush.msrb.mxu2 %v642_v47  ;;  %1504 = vmatpush.msrb.mxu3 %v802_v48  ;;  %v313_v47 = vld [vmem:[#allocation2 + $0x4a8] sm:$0xff] }
 0x174   :  { %1448 = vmatpush.msrb.mxu0 %v282_v49  ;;  %1468 = vmatpush.msrb.mxu1 %v442_v50  ;;  %v473_v48 = vld [vmem:[#allocation2 + $0x9a8] sm:$0xff]  ;;  %v502_v49 = vld [vmem:[#allocation2 + $0xa90] sm:$0xff] }
 0x175   :  { %1485 = vmatpush.msrb.mxu2 %v632_v51  ;;  %1505 = vmatpush.msrb.mxu3 %v792_v52  ;;  %v662_v50 = vld [vmem:[#allocation2 + $0xf90] sm:$0xff]  ;;  %v303_v51 = vld [vmem:[#allocation2 + $0x458] sm:$0xff] }
 0x176   :  { %1449 = vmatpush.msrb.mxu0 %v272_v53  ;;  %1469 = vmatpush.msrb.mxu1 %v432_v54  ;;  %v463_v52 = vld [vmem:[#allocation2 + $0x958] sm:$0xff]  ;;  %v492_v53 = vld [vmem:[#allocation2 + $0xa40] sm:$0xff] }
 0x177   :  { %1486 = vmatpush.msrb.mxu2 %v622_v55  ;;  %1506 = vmatpush.msrb.mxu3 %v782_v56  ;;  %v652_v54 = vld [vmem:[#allocation2 + $0xf40] sm:$0xff]  ;;  %v2176_v55 = vpop.f32.mrf.mxu2  ;;  %v293_v56 = vld [vmem:[#allocation2 + $0x408] sm:$0xff] }
 0x178   :  { %1450 = vmatpush.msrb.mxu0 %v262_v57  ;;  %1470 = vmatpush.msrb.mxu1 %v422_v58  ;;  %v453_v57 = vld [vmem:[#allocation2 + $0x908] sm:$0xff]  ;;  %v2178_v58 = vpop.f32.mrf.mxu3 }
 0x179   :  { %1487 = vmatpush.msrb.mxu2 %v612_v59  ;;  %1507 = vmatpush.msrb.mxu3 %v772_v60  ;;  %v643_v59 = vld [vmem:[#allocation2 + $0xef8] sm:$0xff] }
 0x17a   :  { %1451 = vmatpush.msrb.mxu0 %v252_v61  ;;  %1471 = vmatpush.msrb.mxu1 %v412_v62  ;;  %v803_v60 = vld [vmem:[#allocation2 + $0x13f8] sm:$0xff] }
 0x17b   :  { %1488 = vmatpush.msrb.mxu2 %v602_v63  ;;  %1508 = vmatpush.msrb.mxu3 %v762_v0  ;;  %v283_v61 = vld [vmem:[#allocation2 + $0x3b8] sm:$0xff]  ;;  %v2182_v63 = vpop.f32.mrf.mxu0  ;;  %v2184_v0 = vpop.f32.mrf.mxu1 }
 0x17c   :  { %1452 = vmatpush.msrb.mxu0 %v242_v1  ;;  %1472 = vmatpush.msrb.mxu1 %v402_v2  ;;  %v443_v62 = vld [vmem:[#allocation2 + $0x8b8] sm:$0xff]  ;;  %v633_v1 = vld [vmem:[#allocation2 + $0xea8] sm:$0xff] }
 0x17d   :  { %1489 = vmatpush.msrb.mxu2 %v592_v3  ;;  %1509 = vmatpush.msrb.mxu3 %v752_v4  ;;  %v793_v2 = vld [vmem:[#allocation2 + $0x13a8] sm:$0xff] }
 0x17e   :  { %1453 = vmatpush.msrb.mxu0 %v232_v5  ;;  %1473 = vmatpush.msrb.mxu1 %v392_v6  ;;  %v273_v3 = vld [vmem:[#allocation2 + $0x368] sm:$0xff]  ;;  %v623_v5 = vld [vmem:[#allocation2 + $0xe58] sm:$0xff] }
 0x17f   :  { %1490 = vmatpush.msrb.mxu2 %v582_v7  ;;  %1510 = vmatpush.msrb.mxu3 %v742_v8  ;;  %v433_v4 = vld [vmem:[#allocation2 + $0x868] sm:$0xff]  ;;  %v783_v6 = vld [vmem:[#allocation2 + $0x1358] sm:$0xff] }
 0x180   :  { %1454 = vmatpush.msrb.mxu0 %v222_v9  ;;  %1474 = vmatpush.msrb.mxu1 %v382_v11  ;;  %v263_v7 = vld [vmem:[#allocation2 + $0x318] sm:$0xff]  ;;  %v2186_v9 = vpop.f32.mrf.mxu2  ;;  %v613_v11 = vld [vmem:[#allocation2 + $0xe08] sm:$0xff] }
 0x181   :  { %1491 = vmatpush.msrb.mxu2 %v572_v12  ;;  %1511 = vmatpush.msrb.mxu3 %v732_v13  ;;  %v423_v8 = vld [vmem:[#allocation2 + $0x818] sm:$0xff]  ;;  %v773_v12 = vld [vmem:[#allocation2 + $0x1308] sm:$0xff] }
 0x182   :  { %1455 = vmatpush.msrb.mxu0 %v212_v15  ;;  %1475 = vmatpush.msrb.mxu1 %v372_v16  ;;  %v253_v13 = vld [vmem:[#allocation2 + $0x2c8] sm:$0xff]  ;;  %v2188_v16 = vpop.f32.mrf.mxu3 }
 0x183   :  { %1492 = vmatpush.msrb.mxu2 %v562_v17  ;;  %1512 = vmatpush.msrb.mxu3 %v722_v18  ;;  %v413_v15 = vld [vmem:[#allocation2 + $0x7c8] sm:$0xff]  ;;  %v603_v17 = vld [vmem:[#allocation2 + $0xdb8] sm:$0xff] }
 0x184   :  { %1456 = vmatpush.msrb.mxu0 %v202_v19  ;;  %1476 = vmatpush.msrb.mxu1 %v362_v20  ;;  %v763_v18 = vld [vmem:[#allocation2 + $0x12b8] sm:$0xff] }
 0x185   :  { %1493 = vmatpush.msrb.mxu2 %v552_v25  ;;  %1513 = vmatpush.msrb.mxu3 %v712_v26  ;;  %v243_v19 = vld [vmem:[#allocation2 + $0x278] sm:$0xff]  ;;  %v1061_v25 = vpop.f32.mrf.mxu0  ;;  %v1081_v26 = vpop.f32.mrf.mxu1 }
 0x186   :  { %1457 = vmatpush.msrb.mxu0 %v192_v27  ;;  %1477 = vmatpush.msrb.mxu1 %v352_v28  ;;  %v403_v20 = vld [vmem:[#allocation2 + $0x778] sm:$0xff]  ;;  %v593_v27 = vld [vmem:[#allocation2 + $0xd68] sm:$0xff] }
 0x187   :  { %1494 = vmatpush.msrb.mxu2 %v542_v29  ;;  %1514 = vmatpush.msrb.mxu3 %v702_v30  ;;  %v753_v28 = vld [vmem:[#allocation2 + $0x1268] sm:$0xff] }
 0x188   :  { %1458 = vmatpush.msrb.mxu0 %v182_v31  ;;  %1478 = vmatpush.msrb.mxu1 %v342_v32  ;;  %v233_v29 = vld [vmem:[#allocation2 + $0x228] sm:$0xff]  ;;  %v583_v31 = vld [vmem:[#allocation2 + $0xd18] sm:$0xff] }
 0x189   :  { %1495 = vmatpush.msrb.mxu2 %v532_v34  ;;  %1515 = vmatpush.msrb.mxu3 %v692_v35  ;;  %v393_v30 = vld [vmem:[#allocation2 + $0x728] sm:$0xff]  ;;  %v743_v32 = vld [vmem:[#allocation2 + $0x1218] sm:$0xff] }
 0x18a   :  { %1459 = vmatpush.msrb.mxu0 %v172_v36  ;;  %1479 = vmatpush.msrb.mxu1 %v332_v37  ;;  %v223_v34 = vld [vmem:[#allocation2 + $0x1d8] sm:$0xff]  ;;  %v1101_v36 = vpop.f32.mrf.mxu2  ;;  %v573_v37 = vld [vmem:[#allocation2 + $0xcc8] sm:$0xff] }
 0x18b   :  { %1496 = vmatpush.msrb.mxu2 %v522_v39  ;;  %1516 = vmatpush.msrb.mxu3 %v682_v40  ;;  %v383_v35 = vld [vmem:[#allocation2 + $0x6d8] sm:$0xff]  ;;  %v733_v39 = vld [vmem:[#allocation2 + $0x11c8] sm:$0xff] }
 0x18c   :  { %1460 = vmatmul.f32.vlgmr.msrb.gmra.mxu0 %v2122_v10  ;;  %1480 = vmatmul.f32.vlgmr.msrb.gmra.mxu1 %v2124_v14  ;;  %v213_v40 = vld [vmem:[#allocation2 + $0x188] sm:$0xff] }
 0x18d   :  { %1524 = vmatpush.msra.mxu0 %v323_v41  ;;  %1544 = vmatpush.msra.mxu1 %v483_v42  ;;  %v373_v41 = vld [vmem:[#allocation2 + $0x688] sm:$0xff]  ;;  %v1121_v42 = vpop.f32.mrf.mxu3 }
 0x18e   :  { %1497 = vmatpush.msrb.mxu2 %v512_v43  ;;  %1517 = vmatpush.msrb.mxu3 %v672_v44  ;;  %v563_v43 = vld [vmem:[#allocation2 + $0xc78] sm:$0xff] }
 0x18f   :  { %1525 = vmatpush.msra.mxu0 %v313_v47  ;;  %1545 = vmatpush.msra.mxu1 %v473_v48  ;;  %v723_v44 = vld [vmem:[#allocation2 + $0x1178] sm:$0xff] }
 0x190   :  { %1498 = vmatpush.msrb.mxu2 %v502_v49  ;;  %1518 = vmatpush.msrb.mxu3 %v662_v50  ;;  %v203_v47 = vld [vmem:[#allocation2 + $0x138] sm:$0xff]  ;;  %v1141_v49 = vpop.f32.mrf.mxu0  ;;  %v1161_v50 = vpop.f32.mrf.mxu1 }
 0x191   :  { %1526 = vmatpush.msra.mxu0 %v303_v51  ;;  %1546 = vmatpush.msra.mxu1 %v463_v52  ;;  %v363_v48 = vld [vmem:[#allocation2 + $0x638] sm:$0xff]  ;;  %v553_v51 = vld [vmem:[#allocation2 + $0xc28] sm:$0xff] }
 0x192   :  { %1499 = vmatpush.msrb.mxu2 %v492_v53  ;;  %1519 = vmatpush.msrb.mxu3 %v652_v54  ;;  %v713_v52 = vld [vmem:[#allocation2 + $0x1128] sm:$0xff] }
 0x193   :  { %1500 = vmatmul.f32.vlgmr.msrb.gmra.mxu2 %v2128_v21  ;;  %1520 = vmatmul.f32.vlgmr.msrb.gmra.mxu3 %v2130_v24  ;;  %v193_v53 = vld [vmem:[#allocation2 + $0xe8] sm:$0xff] }
 0x194   :  { %1527 = vmatpush.msra.mxu0 %v293_v56  ;;  %1547 = vmatpush.msra.mxu1 %v453_v57  ;;  %v353_v54 = vld [vmem:[#allocation2 + $0x5e8] sm:$0xff]  ;;  %v842_v56 = vadd.f32 %v2164_v23, %v2162_v22  ;;  %v543_v57 = vld [vmem:[#allocation2 + $0xbd8] sm:$0xff]  ;;  %v922_v22 = vadd.f32 %v2172_v46, %v2170_v45 }
 0x195   :  { %1564 = vmatpush.msra.mxu2 %v643_v59  ;;  %1584 = vmatpush.msra.mxu3 %v803_v60  ;;  %v703_v59 = vld [vmem:[#allocation2 + $0x10d8] sm:$0xff]  ;;  %v1002_v60 = vadd.f32 %v2184_v0, %v2182_v63  ;;  %v333_v63 = vld [vmem:[#allocation2 + $0x548] sm:$0xff] }
 0x196   :  { %1528 = vmatpush.msra.mxu0 %v283_v61  ;;  %1548 = vmatpush.msra.mxu1 %v443_v62  ;;  %v1082_v61 = vadd.f32 %v1081_v26, %v1061_v25  ;;  %v183_v62 = vld [vmem:[#allocation2 + $0x98] sm:$0xff]  ;;  %v862_v0 = vadd.f32 %v2166_v33, %v842_v56  ;;  %v673_v33 = vld [vmem:[#allocation2 + $0xfe8] sm:$0xff] }
 0x197   :  { %1565 = vmatpush.msra.mxu2 %v633_v1  ;;  %1585 = vmatpush.msra.mxu3 %v793_v2  ;;  %v343_v1 = vld [vmem:[#allocation2 + $0x598] sm:$0xff]  ;;  %v1181_v2 = vpop.f32.mrf.mxu2  ;;  %v1022_v23 = vadd.f32 %v2186_v9, %v1002_v60 }
 0x198   :  { %1529 = vmatpush.msra.mxu0 %v273_v3  ;;  %1549 = vmatpush.msra.mxu1 %v433_v4  ;;  %v533_v3 = vld [vmem:[#allocation2 + $0xb88] sm:$0xff]  ;;  %v1864_v60 = vld [vmem:[%s2251_s4] sm:$0xff] }
 0x199   :  { %1566 = vmatpush.msra.mxu2 %v623_v5  ;;  %1586 = vmatpush.msra.mxu3 %v783_v6  ;;  %v693_v4 = vld [vmem:[#allocation2 + $0x1088] sm:$0xff]  ;;  %v1102_v5 = vadd.f32 %v1101_v36, %v1082_v61  ;;  %v1042_v9 = vadd.f32 %v2188_v16, %v1022_v23  ;;  %v503_v16 = vld [vmem:[#allocation2 + $0xa98] sm:$0xff] }
 0x19a   :  { %1530 = vmatpush.msra.mxu0 %v263_v7  ;;  %1550 = vmatpush.msra.mxu1 %v423_v8  ;;  %v173_v6 = vld [vmem:[#allocation2 + $0x48] sm:$0xff]  ;;  %v1201_v7 = vpop.f32.mrf.mxu3  ;;  %v523_v8 = vld [vmem:[#allocation2 + $0xb38] sm:$0xff] }
 0x19b   :  { %1567 = vmatpush.msra.mxu2 %v613_v11  ;;  %1587 = vmatpush.msra.mxu3 %v773_v12  ;;  %v683_v11 = vld [vmem:[#allocation2 + $0x1038] sm:$0xff]  ;;  %v942_v12 = vadd.f32 %v2176_v55, %v922_v22 }
 0x19c   :  { %1531 = vmatpush.msra.mxu0 %v253_v13  ;;  %1551 = vmatpush.msra.mxu1 %v413_v15  ;;  %v1122_v13 = vadd.f32 %v1121_v42, %v1102_v5  ;;  %v513_v15 = vld [vmem:[#allocation2 + $0xae8] sm:$0xff]  ;;  %v1889_v61 = vld [vmem:[#allocation4 + $0x78] sm:$0xff] }
 0x19d   :  { %1568 = vmatpush.msra.mxu2 %v603_v17  ;;  %1588 = vmatpush.msra.mxu3 %v763_v18  ;;  %v882_v17 = vadd.f32 %v2168_v38, %v862_v0  ;;  %v962_v55 = vadd.f32 %v2178_v58, %v942_v12  ;;  %v1162_v18 = vadd.f32 %v1161_v50, %v1141_v49  ;;  %v1885_v0 = vld [vmem:[#allocation4 + $0x58] sm:$0xff]  ;;  %v1904_v12 = vld [vmem:[#allocation4 + $0xf0] sm:$0xff] }
 0x19e   :  { %1532 = vmatpush.msra.mxu0 %v243_v19  ;;  %1552 = vmatpush.msra.mxu1 %v403_v20  ;;  %v663_v20 = vld [vmem:[#allocation2 + $0xf98] sm:$0xff] }
 0x19f   :  { %1569 = vmatpush.msra.mxu2 %v593_v27  ;;  %1589 = vmatpush.msra.mxu3 %v753_v28  ;;  %v1182_v26 = vadd.f32 %v1181_v2, %v1162_v18  ;;  %v1961_v27 = vld [vmem:[%s2250_s3 + $0x8] sm:$0xff]  ;;  %v1900_v18 = vld [vmem:[#allocation4 + $0xd0] sm:$0xff] }
 0x1a0   :  { %1533 = vmatpush.msra.mxu0 %v233_v29  ;;  %1553 = vmatpush.msra.mxu1 %v393_v30 }
 0x1a1   :  { %1570 = vmatpush.msra.mxu2 %v583_v31  ;;  %1590 = vmatpush.msra.mxu3 %v743_v32  ;;  %v1202_v29 = vadd.f32 %v1201_v7, %v1182_v26  ;;  %v1884_v7 = vld [vmem:[#allocation4 + $0x50] sm:$0xff] }
 0x1a2   :  { %1534 = vmatpush.msra.mxu0 %v223_v34  ;;  %1554 = vmatpush.msra.mxu1 %v383_v35  ;;  %v1876_v26 = vld [vmem:[#allocation4 + $0x10] sm:$0xff] }
 0x1a3   :  { %1571 = vmatpush.msra.mxu2 %v573_v37  ;;  %1591 = vmatpush.msra.mxu3 %v733_v39  ;;  %v1221_v45 = vpop.f32.mrf.mxu0  ;;  %v1241_v46 = vpop.f32.mrf.mxu1 }
 0x1a4   :  { %1535 = vmatpush.msra.mxu0 %v213_v40  ;;  %1555 = vmatpush.msra.mxu1 %v373_v41  ;;  %v1242_v19 = vadd.f32 %v1241_v46, %v1221_v45  ;;  %v1882_v45 = vld [vmem:[#allocation4 + $0x40] sm:$0xff]  ;;  %v1903_v46 = vld [vmem:[#allocation4 + $0xe8] sm:$0xff] }
 0x1a5   :  { %1572 = vmatpush.msra.mxu2 %v563_v43  ;;  %1592 = vmatpush.msra.mxu3 %v723_v44  ;;  %v1604_v44 = vld [vmem:[%s2250_s3] sm:$0xff] }
 0x1a6   :  { %1536 = vmatpush.msra.mxu0 %v203_v47  ;;  %1556 = vmatpush.msra.mxu1 %v363_v48  ;;  %v1975_v47 = vld [vmem:[%s2250_s3 + $0x18] sm:$0xff]  ;;  %v1970_v48 = vld [vmem:[%s2250_s3 + $0x10] sm:$0xff] }
 0x1a7   :  { %1573 = vmatpush.msra.mxu2 %v553_v51  ;;  %1593 = vmatpush.msra.mxu3 %v713_v52 }
 0x1a8   :  { %1537 = vmatpush.msra.mxu0 %v193_v53  ;;  %1557 = vmatpush.msra.mxu1 %v353_v54 }
 0x1a9   :  { %1574 = vmatpush.msra.mxu2 %v543_v57  ;;  %1594 = vmatpush.msra.mxu3 %v703_v59  ;;  %v1980_v57 = vld [vmem:[%s2250_s3 + $0x20] sm:$0xff]  ;;  %v2063_v59 = vmov 0  }
 0x1aa   :  { %1538 = vmatpush.msra.mxu0 %v183_v62  ;;  %1558 = vmatpush.msra.mxu1 %v343_v1  ;;  %v1888_v62 = vld [vmem:[#allocation4 + $0x70] sm:$0xff] }
 0x1ab   :  { %1575 = vmatpush.msra.mxu2 %v533_v3  ;;  %1595 = vmatpush.msra.mxu3 %v693_v4 }
 0x1ac   :  { %1539 = vmatpush.msra.mxu0 %v173_v6  ;;  %1559 = vmatpush.msra.mxu1 %v333_v63  ;;  %v1887_v6 = vld [vmem:[#allocation4 + $0x68] sm:$0xff]  ;;  %v1886_v63 = vld [vmem:[#allocation4 + $0x60] sm:$0xff] }
 0x1ad   :  { %1576 = vmatpush.msra.mxu2 %v523_v8  ;;  %1596 = vmatpush.msra.mxu3 %v683_v11  ;;  %v1905_v8 = vld [vmem:[#allocation4 + $0xf8] sm:$0xff]  ;;  %v1883_v11 = vld [vmem:[#allocation4 + $0x48] sm:$0xff] }
 0x1ae   :  { %1540 = vmatmul.f32.vlgmr.msra.gmra.mxu0 %v2122_v10  ;;  %1560 = vmatmul.f32.vlgmr.msra.gmra.mxu1 %v2124_v14  ;;  %v493_v10 = vld [vmem:[#allocation2 + $0xa48] sm:$0xff] }
 0x1af   :  { %1962 = vmatpush.msk.msrb.mxu0 %vm71_vm0, %v1042_v9  ;;  %1964 = vmatpush.msk.msrb.mxu1 %vm71_vm0, %v1122_v13  ;;  %v653_v14 = vld [vmem:[#allocation2 + $0xf48] sm:$0xff]  ;;  %v1881_v9 = vld [vmem:[#allocation4 + $0x38] sm:$0xff]  ;;  %v1902_v13 = vld [vmem:[#allocation4 + $0xe0] sm:$0xff] }
 0x1b0   :  { %1577 = vmatpush.msra.mxu2 %v513_v15  ;;  %1597 = vmatpush.msra.mxu3 %v673_v33  ;;  %v1261_v25 = vpop.f32.mrf.mxu2  ;;  %v1281_v58 = vpop.f32.mrf.mxu3  ;;  %v1880_v15 = vld [vmem:[#allocation4 + $0x30] sm:$0xff]  ;;  %v1901_v33 = vld [vmem:[#allocation4 + $0xd8] sm:$0xff] }
 0x1b1   :  { %1966 = vmatpush.msk.msra.mxu0 %vm71_vm0, %v882_v17  ;;  %1968 = vmatpush.msk.msra.mxu1 %vm71_vm0, %v962_v55  ;;  %v1262_v38 = vadd.f32 %v1261_v25, %v1242_v19  ;;  %v1879_v17 = vld [vmem:[#allocation4 + $0x28] sm:$0xff]  ;;  %v1878_v19 = vld [vmem:[#allocation4 + $0x20] sm:$0xff] }
 0x1b2   :  { %1578 = vmatpush.msra.mxu2 %v503_v16  ;;  %1598 = vmatpush.msra.mxu3 %v663_v20  ;;  %v1899_v16 = vld [vmem:[#allocation4 + $0xc8] sm:$0xff]  ;;  %v1877_v20 = vld [vmem:[#allocation4 + $0x18] sm:$0xff]  ;;  %v1898_v25 = vld [vmem:[#allocation4 + $0xc0] sm:$0xff] }
 0x1b3   :  { %v1282_v28 = vadd.f32 %v1281_v58, %v1262_v38  ;;  %1992 = vset.pattern.permute.xlu0 %v2063_v59  ;;  %v1896_v38 = vld [vmem:[#allocation4 + $0xb0] sm:$0xff] }
 0x1b4   :  { %1579 = vmatpush.msra.mxu2 %v493_v10  ;;  %1599 = vmatpush.msra.mxu3 %v653_v14  ;;  %v1897_v10 = vld [vmem:[#allocation4 + $0xb8] sm:$0xff]  ;;  %v1875_v14 = vld [vmem:[#allocation4 + $0x8] sm:$0xff] }
 0x1b5   :  { %1580 = vmatmul.f32.vlgmr.msra.gmra.mxu2 %v2128_v21  ;;  %1600 = vmatmul.f32.vlgmr.msra.gmra.mxu3 %v2130_v24 }
 0x1b6   :  { %1963 = vmatmul.msk.f32.vlgmr.msrb.gmra.mxu0 %vm67_vm1, %v1961_v27  ;;  %1965 = vmatmul.msk.f32.vlgmr.msrb.gmra.mxu1 %vm67_vm1, %v1961_v27 }
 0x1b7   :  { %1971 = vmatpush.msk.msrb.mxu0 %vm71_vm0, %v1202_v29  ;;  %1973 = vmatpush.msk.msrb.mxu1 %vm71_vm0, %v1282_v28 }
 0x1b8   :  { %1867 = vperm.xlu0 %1992, %v1864_v60  }
 0x1be   :  { %1967 = vmatmul.msk.f32.vlgmr.msra.gmra.mxu0 %vm67_vm1, %v1604_v44  ;;  %1969 = vmatmul.msk.f32.vlgmr.msra.gmra.mxu1 %vm67_vm1, %v1604_v44  ;;  %v1890_v44 = vld [vmem:[#allocation4 + $0x80] sm:$0xff] }
 0x1c5   :  { %v1301_v30 = vpop.f32.mrf.mxu0  ;;  %v1321_v31 = vpop.f32.mrf.mxu1 }
 0x1c6   :  { %v1322_v32 = vadd.f32 %v1321_v31, %v1301_v30  ;;  %1972 = vmatmul.msk.f32.vlgmr.msrb.gmra.mxu0 %vm67_vm1, %v1970_v48  ;;  %1974 = vmatmul.msk.f32.vlgmr.msrb.gmra.mxu1 %vm67_vm1, %v1970_v48  ;;  %v1874_v31 = vld [vmem:[#allocation4] sm:$0xff] }
 0x1d2   :  { %v1341_v34 = vpop.f32.mrf.mxu2  ;;  %v1361_v36 = vpop.f32.mrf.mxu3 }
 0x1d3   :  { %v1342_v35 = vadd.f32 %v1341_v34, %v1322_v32 }
 0x1d5   :  { %v1362_v37 = vadd.f32 %v1361_v36, %v1342_v35 }
 0x1d7   :  { %1976 = vmatpush.msk.msrb.mxu2 %vm71_vm0, %v1362_v37 }
 0x1d8   :  { %1977 = vmatmul.msk.f32.vlgmr.msrb.gmra.mxu2 %vm67_vm1, %v1975_v47 }
 0x1d9   :  { %1906 = vmatpush.msra.mxu2 %v1889_v61 }
 0x1db   :  { %1907 = vmatpush.msra.mxu2 %v1888_v62 }
 0x1dd   :  { %1908 = vmatpush.msra.mxu2 %v1887_v6 }
 0x1df   :  { %1909 = vmatpush.msra.mxu2 %v1886_v63 }
 0x1e1   :  { %1910 = vmatpush.msra.mxu2 %v1885_v0 }
 0x1e3   :  { %1911 = vmatpush.msra.mxu2 %v1884_v7 }
 0x1e5   :  { %1912 = vmatpush.msra.mxu2 %v1883_v11 }
 0x1e7   :  { %v1381_v21 = vpop.f32.mrf.mxu0  ;;  %v1401_v39 = vpop.f32.mrf.mxu1  ;;  %1913 = vmatpush.msra.mxu2 %v1882_v45 }
 0x1e8   :  { %v1402_v24 = vadd.f32 %v1401_v39, %v1381_v21  ;;  %v1895_v21 = vld [vmem:[#allocation4 + $0xa8] sm:$0xff]  ;;  %v1894_v39 = vld [vmem:[#allocation4 + $0xa0] sm:$0xff] }
 0x1e9   :  { %1914 = vmatpush.msra.mxu2 %v1881_v9 }
 0x1eb   :  { %1915 = vmatpush.msra.mxu2 %v1880_v15 }
 0x1ed   :  { %1916 = vmatpush.msra.mxu2 %v1879_v17 }
 0x1ef   :  { %1917 = vmatpush.msra.mxu2 %v1878_v19 }
 0x1f1   :  { %1918 = vmatpush.msra.mxu2 %v1877_v20 }
 0x1f3   :  { %1919 = vmatpush.msra.mxu2 %v1876_v26 }
 0x1f4   :  { %v1421_v40 = vpop.f32.mrf.mxu2  ;;  %v1441_v42 = vpop.f32.mrf.mxu3 }
 0x1f5   :  { %v1422_v41 = vadd.f32 %v1421_v40, %v1402_v24  ;;  %1920 = vmatpush.msra.mxu2 %v1875_v14  ;;  %v1893_v40 = vld [vmem:[#allocation4 + $0x98] sm:$0xff] }
 0x1f7   :  { %v1442_v43 = vadd.f32 %v1441_v42, %v1422_v41  ;;  %1921 = vmatpush.msra.mxu2 %v1874_v31  ;;  %v1892_v41 = vld [vmem:[#allocation4 + $0x90] sm:$0xff]  ;;  %v1891_v42 = vld [vmem:[#allocation4 + $0x88] sm:$0xff] }
 0x1f9   :  { %1978 = vmatpush.msk.msrb.mxu3 %vm71_vm0, %v1442_v43 }
 0x1fa   :  { %1979 = vmatmul.msk.f32.vlgmr.msrb.gmra.mxu3 %vm67_vm1, %v1975_v47 }
 0x1fb   :  { %1926 = vmatpush.msra.mxu3 %v1905_v8 }
 0x1fd   :  { %1927 = vmatpush.msra.mxu3 %v1904_v12 }
 0x1ff   :  { %1928 = vmatpush.msra.mxu3 %v1903_v46 }
 0x201   :  { %1929 = vmatpush.msra.mxu3 %v1902_v13 }
 0x203   :  { %1930 = vmatpush.msra.mxu3 %v1901_v33 }
 0x205   :  { %1931 = vmatpush.msra.mxu3 %v1900_v18 }
 0x207   :  { %1932 = vmatpush.msra.mxu3 %v1899_v16 }
 0x209   :  { %v1461_v49 = vpop.f32.mrf.mxu0  ;;  %v1481_v50 = vpop.f32.mrf.mxu1  ;;  %1933 = vmatpush.msra.mxu3 %v1898_v25 }
 0x20a   :  { %v1482_v51 = vadd.f32 %v1481_v50, %v1461_v49 }
 0x20b   :  { %1934 = vmatpush.msra.mxu3 %v1897_v10 }
 0x20d   :  { %1935 = vmatpush.msra.mxu3 %v1896_v38 }
 0x20f   :  { %1936 = vmatpush.msra.mxu3 %v1895_v21 }
 0x211   :  { %1937 = vmatpush.msra.mxu3 %v1894_v39 }
 0x213   :  { %1938 = vmatpush.msra.mxu3 %v1893_v40 }
 0x215   :  { %1939 = vmatpush.msra.mxu3 %v1892_v41 }
 0x216   :  { %v1501_v52 = vpop.f32.mrf.mxu2  ;;  %v1521_v54 = vpop.f32.mrf.mxu3 }
 0x217   :  { %v1502_v53 = vadd.f32 %v1501_v52, %v1482_v51  ;;  %1940 = vmatpush.msra.mxu3 %v1891_v42 }
 0x219   :  { %v1522_v56 = vadd.f32 %v1521_v54, %v1502_v53  ;;  %1941 = vmatpush.msra.mxu3 %v1890_v44 }
 0x21b   :  { %1981 = vmatpush.msk.msra.mxu0 %vm71_vm0, %v1522_v56 }
 0x21c   :  { %1982 = vmatmul.msk.f32.vlgmr.msra.gmra.mxu0 %vm67_vm1, %v1980_v57 }
 0x22a   :  { %v1868_v35 = vpop.permute.xlu0 %1867 }
 0x22b   :  { %v1541_v1 = vpop.f32.mrf.mxu0  ;;  %v1561_v2 = vpop.f32.mrf.mxu1 }
 0x22c   :  { %v1562_v3 = vadd.f32 %v1561_v2, %v1541_v1 }
 0x233   :  { %v1633_v55 = vpop.f32.mrf.mxu0  ;;  %v1653_v24 = vpop.f32.mrf.mxu1 }
 0x238   :  { %v1581_v4 = vpop.f32.mrf.mxu2  ;;  %v1601_v23 = vpop.f32.mrf.mxu3 }
 0x239   :  { %v1582_v22 = vadd.f32 %v1581_v4, %v1562_v3 }
 0x23b   :  { %v1602_v5 = vadd.f32 %v1601_v23, %v1582_v22  ;;  %v1682_v58 = vpop.f32.mrf.mxu0  ;;  %v1702_v47 = vpop.f32.mrf.mxu1 }
 0x23c   :  { %v1683_v27 = vadd.f32 %v1682_v58, %v1633_v55  ;;  %v1703_v48 = vadd.f32 %v1702_v47, %v1653_v24 }
 0x23d   :  { %1983 = vmatpush.msk.msra.mxu1 %vm71_vm0, %v1602_v5 }
 0x23e   :  { %1984 = vmatmul.msk.f32.vlgmr.msra.gmra.mxu1 %vm67_vm1, %v1980_v57 }
 0x243   :  { %v1733_v28 = vpop.f32.mrf.mxu0  ;;  %v1753_v49 = vpop.f32.mrf.mxu1 }
 0x244   :  { %v1756_v29 = vadd.f32 %v1733_v28, %v1683_v27  ;;  %v1757_v50 = vadd.f32 %v1753_v49, %v1703_v48 }
 0x25b   :  { %v1786_v30 = vpop.f32.mrf.mxu2 }
 0x25c   :  { %v1809_v32 = vadd.f32 %v1786_v30, %v1756_v29 }
 0x27d   :  { %v1806_v51 = vpop.f32.mrf.mxu3 }
 0x27e   :  { %v1810_v52 = vadd.f32 %v1806_v51, %v1757_v50 }
 0x299   :  { %v1839_v34 = vpop.f32.mrf.mxu0 }
 0x29a   :  { %v1862_v36 = vadd.f32 %v1839_v34, %v1809_v32 }
 0x29c   :  { %v1870_v37 = vadd.f32 %v1868_v35, %v1862_v36 }
 0x29e   :  { %2001 = vtanh.f32 %v1870_v37 }
 0x2a4   :  { %v2002_v43 = vpop.eup %2001 }
 0x2a5   :  { %1922 = vmatmul.f32.vlgmr.msra.gmra.mxu2 %v2002_v43 }
 0x2bb   :  { %v1859_v53 = vpop.f32.mrf.mxu1 }
 0x2bc   :  { %v1863_v54 = vadd.f32 %v1859_v53, %v1810_v52 }
 0x2be   :  { %v1871_v56 = vadd.f32 %v1868_v35, %v1863_v54 }
 0x2c0   :  { %2003 = vtanh.f32 %v1871_v56 }
 0x2c6   :  { %v2004_v57 = vpop.eup %2003 }
 0x2c7   :  { %1942 = vmatmul.f32.vlgmr.msra.gmra.mxu3 %v2004_v57 }
 0x328   :  { %v1923_v59 = vpop.f32.mrf.mxu2 }
 0x34a   :  { %v1943_v60 = vpop.f32.mrf.mxu3 }
 0x34b   :  { %v1944_v61 = vadd.f32 %v1943_v60, %v1923_v59 }
 0x34d   :  { %1946 = vst [vmem:[%s2253_s6] sm:$0xff] %v1944_v61 }
 0x34e   :  { %1951 = vsyncpa [#allocation3], 1 }
 0x34f   :  { %1952 = vsyncpa [#allocation5], 1 }

</bundles_post_ra>
